<compile_context>
chip_gen: v7x
topology: tpu7x:2x2x1
jax: 0.10.0
libtpu: 0.0.40
codegen_flags: <defaults>
</compile_context>

<pallas_src>
import functools

import jax
import jax.numpy as jnp
from jax.experimental import pallas as pl
from jax.experimental.pallas import tpu as pltpu

HIDDEN = 256  # fixed by the module definition (nn.Conv2d(..., 256, kernel_size=1))


def _round_up(x, m):
    return (x + m - 1) // m * m


def _local_disc_kernel(x_ref, w0_ref, b0_ref, w1_ref, b1_ref, w2_ref, b2_ref,
                       o_ref):
    # x_ref: (Bb, C, TP) f32      w0: (256, C)   bf16    b0: (256, 1) f32
    # w1:    (256, 256)  bf16     b1: (256, 1)   f32
    # w2:    (256, 1)    f32      b2: (1, 1)     f32 scalar in SMEM
    # o_ref: (Bb, 1, TP) f32
    w0 = w0_ref[...]
    w1 = w1_ref[...]
    b0 = b0_ref[...]
    b1 = b1_ref[...]
    w2 = w2_ref[...]
    b2 = b2_ref[0, 0]
    for b in range(x_ref.shape[0]):           # static (small) sub-batch loop
        x = x_ref[b].astype(jnp.bfloat16)     # in-kernel bf16 cast (VPU)
        h = jnp.dot(w0, x, preferred_element_type=jnp.float32)
        h = jnp.maximum(h + b0, 0.0)          # relu(c0(x))
        h = jnp.dot(w1, h.astype(jnp.bfloat16),
                    preferred_element_type=jnp.float32)
        h = jnp.maximum(h + b1, 0.0)          # relu(c1(h))
        # Final 256 -> 1 layer: broadcast multiply (VPU) + cross-sublane sum
        # (XLU) instead of an M=1 MXU pass that would cost as much as layer 1.
        out = jnp.sum(w2 * h, axis=0, keepdims=True)            # (1, TP) f32
        o_ref[b] = (out + b2).astype(o_ref.dtype)               # c2(h)


def local_discriminator_forward(x_nchw, params, *, pix_tile=2048):
    """x_nchw: [B, C_in, H, W] float32.  Returns [B, 1, H, W] float32."""
    assert pix_tile % 128 == 0, "pix_tile must be a multiple of 128 lanes"
    w0, b0, w1, b1, w2, b2 = params
    B, C, H, W = x_nchw.shape
    HW = H * W

    # Pixel (lane) tile: multiple of 128, capped at pix_tile.
    tile = min(pix_tile, _round_up(HW, 128))
    HW_pad = _round_up(HW, tile)
    pix_steps = HW_pad // tile

    # Single batch element + single pixel tile: split pixels so both v7x
    # TensorCores get a grid step.
    if B * pix_steps < 2 and HW >= 256:
        tile = _round_up((HW + 1) // 2, 128)
        HW_pad = _round_up(HW, tile)
        pix_steps = HW_pad // tile

    # Small-spatial workloads: fold several whole batch elements into each
    # grid step so the fixed per-step pipeline cost (~600 cycles) and the
    # per-step MXU weight pushes amortize over more pixel columns.  Keep at
    # least 2 total grid steps when the batch allows it (two v7x TensorCores).
    Bb = 1
    if pix_steps == 1 and HW_pad < pix_tile and B > 1:
        budget = max(1, pix_tile // HW_pad)
        for cand in range(min(B, budget), 0, -1):
            if B % cand == 0 and (B // cand) * pix_steps >= 2:
                Bb = cand
                break

    grid = (B // Bb, pix_steps)

    # x stays f32 (cast to bf16 inside the kernel).  NCHW -> (B, C, HW) is a
    # free reshape, so there is no wrapper-side HBM pass unless HW needs
    # lane padding.
    x3 = x_nchw.reshape(B, C, HW)
    if HW_pad != HW:
        # TODO(synk): handle the ragged last pixel tile with masked stores to
        # avoid this (small, f32) padding copy.
        x3 = jnp.pad(x3, ((0, 0), (0, 0), (0, HW_pad - HW)))

    # Weights: bf16 MXU operands for layers 0/1, f32 column for the VPU layer 2.
    w0b = w0.astype(jnp.bfloat16)
    w1b = w1.astype(jnp.bfloat16)
    w2c = w2.reshape(HIDDEN, 1).astype(jnp.float32)
    # NOTE: folding b0 into w0 (K = C+1) was considered, but it would require
    # appending a ones row to x in the wrapper (an extra HBM pass) for a
    # few-percent VPU win, so the plain f32 bias add is kept instead.

    # Rough VMEM need: f32 intermediates + double-buffered x/out tiles + weights.
    est = (4 * HIDDEN * tile * 4
           + 2 * Bb * tile * (C * 4 + 4)
           + 2 * (HIDDEN * (C + HIDDEN) * 2 + HIDDEN * 12))
    cp_kwargs = dict(dimension_semantics=("parallel", "parallel"))
    if est > 10 * 1024 * 1024:
        # Generation-aware ceiling: ~48 MiB on v7x (64 MiB VMEM/TC), ~96 MiB
        # on v5e/v6e (128 MiB VMEM).
        try:
            cap = int(0.75 * pltpu.get_tpu_info().vmem_capacity_bytes)
        except Exception:
            cap = 48 * 1024 * 1024
        cp_kwargs["vmem_limit_bytes"] = int(
            min(max(2 * est, 16 * 1024 * 1024), cap))

    out = pl.pallas_call(
        _local_disc_kernel,
        out_shape=jax.ShapeDtypeStruct((B, 1, HW_pad), jnp.float32),
        grid_spec=pltpu.PrefetchScalarGridSpec(
            num_scalar_prefetch=0,
            grid=grid,
            in_specs=[
                pl.BlockSpec((Bb, C, tile), lambda b, p: (b, 0, p)),   # x tile (f32)
                pl.BlockSpec((HIDDEN, C), lambda b, p: (0, 0)),        # w0 bf16
                pl.BlockSpec((HIDDEN, 1), lambda b, p: (0, 0)),        # b0 f32
                pl.BlockSpec((HIDDEN, HIDDEN), lambda b, p: (0, 0)),   # w1 bf16
                pl.BlockSpec((HIDDEN, 1), lambda b, p: (0, 0)),        # b1 f32
                pl.BlockSpec((HIDDEN, 1), lambda b, p: (0, 0)),        # w2 f32 column
                pl.BlockSpec(memory_space=pltpu.MemorySpace.SMEM),     # b2 scalar
            ],
            out_specs=pl.BlockSpec((Bb, 1, tile), lambda b, p: (b, 0, p)),
        ),
        compiler_params=pltpu.CompilerParams(**cp_kwargs),
    )(x3, w0b, b0, w1b, b1, w2c, b2)

    # [B, 1, HW_pad] -> drop pixel padding -> [B, 1, H, W]   (free reshape)
    return out[:, :, :HW].reshape(B, 1, H, W)


def init_params(key, c_in):
    """Deterministic init mimicking PyTorch Conv2d default (U(+-1/sqrt(fan_in))).

    Conv weights of shape (out, in, 1, 1) are stored directly as (out, in)
    matmul matrices; biases as (out, 1) columns so everything is 2-D in VMEM.
    """
    def layer(k, fan_in, fan_out):
        kw, kb = jax.random.split(k)
        bound = 1.0 / jnp.sqrt(jnp.float32(fan_in))
        w = jax.random.uniform(kw, (fan_out, fan_in), jnp.float32, -bound, bound)
        b = jax.random.uniform(kb, (fan_out, 1), jnp.float32, -bound, bound)
        return w, b

    k0, k1, k2 = jax.random.split(key, 3)
    w0, b0 = layer(k0, c_in, HIDDEN)
    w1, b1 = layer(k1, HIDDEN, HIDDEN)
    w2, b2 = layer(k2, HIDDEN, 1)
    return (w0, b0, w1, b1, w2, b2)


def reference_forward_f32(x_nchw, params):
    """Pure-JAX f32 reference: three 1x1 convs as per-pixel matmuls."""
    w0, b0, w1, b1, w2, b2 = params
    B, C, H, W = x_nchw.shape
    x = x_nchw.reshape(B, C, H * W)
    h = jnp.maximum(jnp.einsum('oc,bcp->bop', w0, x) + b0[None], 0.0)
    h = jnp.maximum(jnp.einsum('oc,bcp->bop', w1, h) + b1[None], 0.0)
    o = jnp.einsum('oc,bcp->bop', w2, h) + b2[None]
    return o.reshape(B, 1, H, W)


def reference_forward_matched(x_nchw, params):
    """Reference mirroring kernel numerics: bf16 MXU operands for layers 0/1,
    f32 multiply-reduce for layer 2, f32 accumulation throughout."""
    w0, b0, w1, b1, w2, b2 = params
    B, C, H, W = x_nchw.shape
    x = x_nchw.astype(jnp.bfloat16).reshape(B, C, H * W)
    h = jnp.einsum('oc,bcp->bop', w0.astype(jnp.bfloat16), x,
                   preferred_element_type=jnp.float32)
    h = jnp.maximum(h + b0[None], 0.0)
    h = jnp.einsum('oc,bcp->bop', w1.astype(jnp.bfloat16),
                   h.astype(jnp.bfloat16), preferred_element_type=jnp.float32)
    h = jnp.maximum(h + b1[None], 0.0)
    o = jnp.einsum('oc,bcp->bop', w2, h)           # f32, matches the VPU path
    return (o + b2[None]).reshape(B, 1, H, W)


if __name__ == "__main__":
    # Small shapes consistent with the module: y_size=8, M_channels=24 ->
    # concatenated input channels = 32; batch=2; spatial 16x16
    # (H*W = 256 lane-dense pixels per batch element).
    B, Y_SIZE, M_CHANNELS, H, W = 2, 8, 24, 16, 16
    C_IN = Y_SIZE + M_CHANNELS

    key = jax.random.PRNGKey(0)
    kx, kp = jax.random.split(key)
    x = jax.random.normal(kx, (B, C_IN, H, W), jnp.float32)   # NCHW, like torch
    params = init_params(kp, C_IN)

    fwd = jax.jit(functools.partial(local_discriminator_forward, pix_tile=2048))
    out = fwd(x, params)
    jax.block_until_ready(out)
    assert out.shape == (B, 1, H, W), out.shape

    # Tight check vs a JAX reference with identical mixed-precision numerics.
    ref_m = reference_forward_matched(x, params)
    assert jnp.allclose(out, ref_m, atol=5e-3, rtol=5e-3), \
        "mismatch vs numerics-matched reference"
    # Loose check vs the full-f32 reference (bounds bf16 quantization noise).
    ref_f32 = reference_forward_f32(x, params)
    assert jnp.allclose(out, ref_f32, atol=1e-1, rtol=1e-1), \
        "mismatch vs f32 reference"

    print("KERNEL_OK")
</pallas_src>

<mosaic_0001>
module attributes {stable_mosaic.version = 11 : i64} {
  func.func @_local_disc_kernel(%arg0: i32, %arg1: i32, %arg2: memref<1x32x256xf32, #tpu.memory_space<vmem>>, %arg3: memref<256x32xbf16, #tpu.memory_space<vmem>>, %arg4: memref<256x1xf32, #tpu.memory_space<vmem>>, %arg5: memref<256x256xbf16, #tpu.memory_space<vmem>>, %arg6: memref<256x1xf32, #tpu.memory_space<vmem>>, %arg7: memref<256x1xf32, #tpu.memory_space<vmem>>, %arg8: memref<1x1xf32, #tpu.memory_space<smem>>, %arg9: memref<1x1x256xf32, #tpu.memory_space<vmem>>) attributes {dimension_semantics = [#tpu.dimension_semantics<parallel>, #tpu.dimension_semantics<parallel>], iteration_bounds = array<i64: 2, 1>, scalar_prefetch = 0 : i64, scratch_operands = 0 : i64, tpu.core_type = #tpu.core_type<tc>, window_params = [{transform_indices = @transform_0, window_bounds = array<i64: 1, 32, 256>}, {pipeline_mode = #tpu.pipeline_mode<synchronous>, transform_indices = @transform_1, window_bounds = array<i64: 256, 32>}, {pipeline_mode = #tpu.pipeline_mode<synchronous>, transform_indices = @transform_2, window_bounds = array<i64: 256, 1>}, {pipeline_mode = #tpu.pipeline_mode<synchronous>, transform_indices = @transform_3, window_bounds = array<i64: 256, 256>}, {pipeline_mode = #tpu.pipeline_mode<synchronous>, transform_indices = @transform_4, window_bounds = array<i64: 256, 1>}, {pipeline_mode = #tpu.pipeline_mode<synchronous>, transform_indices = @transform_5, window_bounds = array<i64: 256, 1>}, {transform_indices = @transform_6, window_bounds = array<i64: 1, 1>}, {transform_indices = @transform_7, window_bounds = array<i64: 1, 1, 256>}]} {
    %c0 = arith.constant 0 : index
    %c0_0 = arith.constant 0 : index
    %0 = vector.load %arg3[%c0, %c0_0] : memref<256x32xbf16, #tpu.memory_space<vmem>>, vector<256x32xbf16>
    %c0_1 = arith.constant 0 : index
    %c0_2 = arith.constant 0 : index
    %1 = vector.load %arg5[%c0_1, %c0_2] : memref<256x256xbf16, #tpu.memory_space<vmem>>, vector<256x256xbf16>
    %c0_3 = arith.constant 0 : index
    %c0_4 = arith.constant 0 : index
    %2 = vector.load %arg4[%c0_3, %c0_4] : memref<256x1xf32, #tpu.memory_space<vmem>>, vector<256x1xf32>
    %c0_5 = arith.constant 0 : index
    %c0_6 = arith.constant 0 : index
    %3 = vector.load %arg6[%c0_5, %c0_6] : memref<256x1xf32, #tpu.memory_space<vmem>>, vector<256x1xf32>
    %c0_7 = arith.constant 0 : index
    %c0_8 = arith.constant 0 : index
    %4 = vector.load %arg7[%c0_7, %c0_8] : memref<256x1xf32, #tpu.memory_space<vmem>>, vector<256x1xf32>
    %c0_9 = arith.constant 0 : index
    %c0_10 = arith.constant 0 : index
    %5 = memref.load %arg8[%c0_9, %c0_10] : memref<1x1xf32, #tpu.memory_space<smem>>
    %c0_11 = arith.constant 0 : index
    %c0_12 = arith.constant 0 : index
    %c0_13 = arith.constant 0 : index
    %6 = vector.load %arg2[%c0_11, %c0_12, %c0_13] : memref<1x32x256xf32, #tpu.memory_space<vmem>>, vector<1x32x256xf32>
    %7 = vector.shape_cast %6 : vector<1x32x256xf32> to vector<32x256xf32>
    %8 = arith.truncf %7 : vector<32x256xf32> to vector<32x256xbf16>
    %cst = arith.constant dense<0.000000e+00> : vector<256x256xf32>
    %9 = tpu.matmul %0, %8, %cst {dimension_numbers = #tpu.dot_dimension_numbers<[1], [0], [0], [1], [0, 0, 1, 1], [], []>} : vector<256x32xbf16>, vector<32x256xbf16>, vector<256x256xf32> -> vector<256x256xf32>
    %10 = vector.broadcast %2 : vector<256x1xf32> to vector<256x256xf32>
    %11 = arith.addf %9, %10 : vector<256x256xf32>
    %cst_14 = arith.constant 0.000000e+00 : f32
    %12 = vector.broadcast %cst_14 : f32 to vector<256x256xf32>
    %13 = arith.maximumf %11, %12 : vector<256x256xf32>
    %14 = arith.truncf %13 : vector<256x256xf32> to vector<256x256xbf16>
    %cst_15 = arith.constant dense<0.000000e+00> : vector<256x256xf32>
    %15 = tpu.matmul %1, %14, %cst_15 {dimension_numbers = #tpu.dot_dimension_numbers<[1], [0], [0], [1], [0, 0, 1, 1], [], []>} : vector<256x256xbf16>, vector<256x256xbf16>, vector<256x256xf32> -> vector<256x256xf32>
    %16 = vector.broadcast %3 : vector<256x1xf32> to vector<256x256xf32>
    %17 = arith.addf %15, %16 : vector<256x256xf32>
    %cst_16 = arith.constant 0.000000e+00 : f32
    %18 = vector.broadcast %cst_16 : f32 to vector<256x256xf32>
    %19 = arith.maximumf %17, %18 : vector<256x256xf32>
    %20 = vector.broadcast %4 : vector<256x1xf32> to vector<256x256xf32>
    %21 = arith.mulf %20, %19 : vector<256x256xf32>
    %cst_17 = arith.constant dense<0.000000e+00> : vector<256xf32>
    %22 = vector.multi_reduction <add>, %21, %cst_17 [0] : vector<256x256xf32> to vector<256xf32>
    %23 = vector.shape_cast %22 : vector<256xf32> to vector<1x256xf32>
    %24 = vector.broadcast %5 : f32 to vector<1x256xf32>
    %25 = arith.addf %23, %24 : vector<1x256xf32>
    %c0_18 = arith.constant 0 : index
    %c0_19 = arith.constant 0 : index
    %c0_20 = arith.constant 0 : index
    %26 = vector.load %arg9[%c0_18, %c0_19, %c0_20] : memref<1x1x256xf32, #tpu.memory_space<vmem>>, vector<1x1x256xf32>
    %27 = vector.shape_cast %26 : vector<1x1x256xf32> to vector<1x256xf32>
    %28 = vector.shape_cast %25 : vector<1x256xf32> to vector<1x1x256xf32>
    tpu.vector_store %arg9[%c0_18, %c0_19, %c0_20], %28 {strides = array<i32>} : memref<1x1x256xf32, #tpu.memory_space<vmem>>, vector<1x1x256xf32>,
    return
  }
  func.func @transform_0(%arg0: i32, %arg1: i32) -> (i32, i32, i32) {
    %c0_i32 = arith.constant 0 : i32
    %c0_i32_0 = arith.constant 0 : i32
    return %arg0, %c0_i32, %arg1 : i32, i32, i32
  }
  func.func @transform_1(%arg0: i32, %arg1: i32) -> (i32, i32) {
    %c0_i32 = arith.constant 0 : i32
    %c0_i32_0 = arith.constant 0 : i32
    %c0_i32_1 = arith.constant 0 : i32
    return %c0_i32, %c0_i32_0 : i32, i32
  }
  func.func @transform_2(%arg0: i32, %arg1: i32) -> (i32, i32) {
    %c0_i32 = arith.constant 0 : i32
    %c0_i32_0 = arith.constant 0 : i32
    %c0_i32_1 = arith.constant 0 : i32
    return %c0_i32, %c0_i32_0 : i32, i32
  }
  func.func @transform_3(%arg0: i32, %arg1: i32) -> (i32, i32) {
    %c0_i32 = arith.constant 0 : i32
    %c0_i32_0 = arith.constant 0 : i32
    %c0_i32_1 = arith.constant 0 : i32
    return %c0_i32, %c0_i32_0 : i32, i32
  }
  func.func @transform_4(%arg0: i32, %arg1: i32) -> (i32, i32) {
    %c0_i32 = arith.constant 0 : i32
    %c0_i32_0 = arith.constant 0 : i32
    %c0_i32_1 = arith.constant 0 : i32
    return %c0_i32, %c0_i32_0 : i32, i32
  }
  func.func @transform_5(%arg0: i32, %arg1: i32) -> (i32, i32) {
    %c0_i32 = arith.constant 0 : i32
    %c0_i32_0 = arith.constant 0 : i32
    %c0_i32_1 = arith.constant 0 : i32
    return %c0_i32, %c0_i32_0 : i32, i32
  }
  func.func @transform_6(%arg0: i32, %arg1: i32) -> (i32, i32) {
    %c0_i32 = arith.constant 0 : i32
    %c0_i32_0 = arith.constant 0 : i32
    %c0_i32_1 = arith.constant 0 : i32
    return %c0_i32, %c0_i32_0 : i32, i32
  }
  func.func @transform_7(%arg0: i32, %arg1: i32) -> (i32, i32, i32) {
    %c0_i32 = arith.constant 0 : i32
    %c0_i32_0 = arith.constant 0 : i32
    return %arg0, %c0_i32, %arg1 : i32, i32, i32
  }
}

</mosaic_0001>

<bundles_post_ra>
// kernel: local_discriminator_forward.1
= control target key start
LH: loop header
LB: loop body
LE: loop exit
PB: predicated region body
PF: predicated region fallthrough
CT: control target
= control target key end

     0   :  { %s2319_s26 = smov 0   ;;  %s2321_s27 = smov 0   ;;  %s2938_s0 = inlined_call_operand.vmem [shape: f32[2,32,256], index: 0, kind: input, shape index: {}]   ;;  %s2939_s1 = inlined_call_operand.vmem [shape: bf16[256,32], index: 1, kind: input, shape index: {}]   ;;  %s2940_s2 = inlined_call_operand.vmem [shape: f32[256,1], index: 2, kind: input, shape index: {}]   ;;  %s2941_s3 = inlined_call_operand.vmem [shape: bf16[256,256], index: 3, kind: input, shape index: {}]   ;;  %s2942_s4 = inlined_call_operand.vmem [shape: f32[256,1], index: 4, kind: input, shape index: {}]   ;;  %s2943_s5 = inlined_call_operand.vmem [shape: f32[256,1], index: 5, kind: input, shape index: {}]   ;;  %s2944_s6 = inlined_call_operand.<no memory space> [shape: f32[1,1], index: 6, kind: input, shape index: {}]   ;;  %s2945_s7 = inlined_call_operand.vmem [shape: f32[2,1,256], index: 7, kind: output, shape index: {}]  }
   0x1   :  { %12 = sst [smem:[#allocation2]] %s2944_s6  ;;  %s2323_s28 = smov 0  }
   0x2 LB: > { %s30_s6 = sadd.s32 1, %s2268_s27  ;;  %p2055_p0 = scmp.ge.s32.totalorder %s2272_s28, 1  ;;  %s2272_s28 = sphi %s2323_s28, %s18_s28   ;;  %s2268_s27 = sphi %s2321_s27, %s2947_s27   ;;  %s2264_s26 = sphi %s2319_s26, %s2946_s26  }
   0x3   : > { %p32_p1 = scmp.ge.s32.totalorder %s30_s6, 2  ;;  %p259_p2 = scmp.lt.s32.totalorder %s2272_s28, 3 }
   0x5   : > { %s2949_s6 = smov (%p32_p1, %s30_s6), 0  ;;  %p260_p3 = pnand %p2055_p0, %p259_p2 }
   0x6   : > { %v384_v0 = vld [vmem:[%s2940_s2 + $0x10] sm:$0xff] (!%p260_p3)  ;;  %v382_v1 = vld [vmem:[%s2940_s2] sm:$0xff] (!%p260_p3)  ;;  %p299_p4 = scmp.lt.s32.totalorder (!%p260_p3), %s2264_s26, 1  ;;  %v2274_v2 = vmov (!%p260_p3), 0   ;;  %v385_v3 = vld [vmem:[%s2940_s2 + $0x18] sm:$0xff] (!%p260_p3)  ;;  %vm731_vm0 = vcmask (!%p260_p3), 261120  }
   0x7   : > { %263 = sbr.rel (%p260_p3) target bundleno = 713 (0x2c9), region = 48  ;;  %2185 = vset.pattern.permute.xlu1 (!%p260_p3), %v2274_v2  ;;  %2184 = vset.pattern.permute.xlu0 (!%p260_p3), %v2274_v2  ;;  %v383_v4 = vld [vmem:[%s2940_s2 + $0x8] sm:$0xff] (!%p260_p3)  ;;  %v386_v6 = vld [vmem:[%s2940_s2 + $0x20] sm:$0xff] (!%p260_p3)  ;;  %v389_v18 = vld [vmem:[%s2940_s2 + $0x38] sm:$0xff] (!%p260_p3)  ;;  %s478_s18 = sld [smem:[#allocation2]] (!%p260_p3) }
   0x8   : > { %503 = vperm.xlu1 (!%p260_p3), %2185, %v384_v0   ;;  %493 = vperm.xlu0 (!%p260_p3), %2184, %v382_v1   ;;  %v387_v5 = vld [vmem:[%s2940_s2 + $0x28] sm:$0xff] (!%p260_p3)  ;;  %v388_v19 = vld [vmem:[%s2940_s2 + $0x30] sm:$0xff] (!%p260_p3)  ;;  %v2186_v21 = vld [vmem:[%s2939_s1] sm:$0xff] (!%p260_p3)  }
   0x9   : > { %812 = vmatprep.mubr.bf16.mxu0 (!%p260_p3), %v2274_v2  ;;  %v391_v22 = vld [vmem:[%s2940_s2 + $0x48] sm:$0xff] (!%p260_p3)  ;;  %v390_v23 = vld [vmem:[%s2940_s2 + $0x40] sm:$0xff] (!%p260_p3)  ;;  %v393_v24 = vld [vmem:[%s2940_s2 + $0x58] sm:$0xff] (!%p260_p3) }
   0xa   : > { %v392_v25 = vld [vmem:[%s2940_s2 + $0x50] sm:$0xff] (!%p260_p3)  ;;  %v2187_v26 = vld [vmem:[%s2939_s1 + $0x8] sm:$0xff] (!%p260_p3)   ;;  %v394_v28 = vld [vmem:[%s2940_s2 + $0x60] sm:$0xff] (!%p260_p3) }
   0xb   : > { %v395_v27 = vld [vmem:[%s2940_s2 + $0x68] sm:$0xff] (!%p260_p3)  ;;  %v397_v29 = vld [vmem:[%s2940_s2 + $0x78] sm:$0xff] (!%p260_p3)  ;;  %v396_v30 = vld [vmem:[%s2940_s2 + $0x70] sm:$0xff] (!%p260_p3) }
   0xc   : > { %508 = vperm.xlu1 (!%p260_p3), %2185, %v385_v3   ;;  %498 = vperm.xlu0 (!%p260_p3), %2184, %v383_v4   ;;  %v2188_v31 = vld [vmem:[%s2939_s1 + $0x10] sm:$0xff] (!%p260_p3)   ;;  %v399_v32 = vld [vmem:[%s2940_s2 + $0x88] sm:$0xff] (!%p260_p3)  ;;  %v398_v33 = vld [vmem:[%s2940_s2 + $0x80] sm:$0xff] (!%p260_p3) }
   0xd   : > { %v401_v34 = vld [vmem:[%s2940_s2 + $0x98] sm:$0xff] (!%p260_p3)  ;;  %v400_v35 = vld [vmem:[%s2940_s2 + $0x90] sm:$0xff] (!%p260_p3)  ;;  %v403_v37 = vld [vmem:[%s2940_s2 + $0xa8] sm:$0xff] (!%p260_p3) }
   0xe   : > { %s2951_s26 = smov (!%p299_p4, %s2264_s26), 1  ;;  %v2189_v36 = vld [vmem:[%s2939_s1 + $0x18] sm:$0xff]   ;;  %v402_v38 = vld [vmem:[%s2940_s2 + $0xa0] sm:$0xff]  ;;  %v404_v40 = vld [vmem:[%s2940_s2 + $0xb0] sm:$0xff] }
   0xf   : > { %s2125_s14 = sshll.u32 %s2951_s26, 6  ;;  %v405_v39 = vld [vmem:[%s2940_s2 + $0xb8] sm:$0xff]  ;;  %v2190_v41 = vld [vmem:[%s2939_s1 + $0x20] sm:$0xff]   ;;  %v407_v42 = vld [vmem:[%s2940_s2 + $0xc8] sm:$0xff]  ;;  %s2058_s19 = sshll.u32 %s2951_s26, 1 }
  0x10   : > { %s306_s17 = scalar_lea.vmem %s2938_s0, %s2125_s14  ;;  %518 = vperm.xlu1 %2185, %v387_v5   ;;  %513 = vperm.xlu0 %2184, %v386_v6   ;;  %v406_v43 = vld [vmem:[%s2940_s2 + $0xc0] sm:$0xff]  ;;  %v409_v44 = vld [vmem:[%s2940_s2 + $0xd8] sm:$0xff]  ;;  %v408_v45 = vld [vmem:[%s2940_s2 + $0xd0] sm:$0xff]  ;;  %s315_s22 = scalar_lea.vmem %s2945_s7, %s2058_s19 }
  0x11   : > { %v480_v7 = vld [vmem:[%s306_s17 + $0x8] sm:$0xff]  ;;  %v482_v8 = vld [vmem:[%s306_s17 + $0x18] sm:$0xff]  ;;  %v479_v9 = vld [vmem:[%s306_s17] sm:$0xff] }
  0x12   : > { %v488_v10 = vpack.c.bf16 %v482_v8, %v480_v7  ;;  %v481_v11 = vld [vmem:[%s306_s17 + $0x10] sm:$0xff]  ;;  %v484_v12 = vld [vmem:[%s306_s17 + $0x28] sm:$0xff]  ;;  %v486_v13 = vld [vmem:[%s306_s17 + $0x38] sm:$0xff] }
  0x13   : > { %v487_v14 = vpack.c.bf16 %v481_v11, %v479_v9  ;;  %v490_v15 = vpack.c.bf16 %v486_v13, %v484_v12  ;;  %v483_v16 = vld [vmem:[%s306_s17 + $0x20] sm:$0xff]  ;;  %v485_v17 = vld [vmem:[%s306_s17 + $0x30] sm:$0xff]  ;;  %v2191_v46 = vld [vmem:[%s2939_s1 + $0x28] sm:$0xff]  }
  0x14   : > { %780 = vmatprep.subr.bf16.mxu0 %v488_v10  ;;  %v489_v20 = vpack.c.bf16 %v485_v17, %v483_v16  ;;  %528 = vperm.xlu1 %2185, %v389_v18   ;;  %v411_v47 = vld [vmem:[%s2940_s2 + $0xe8] sm:$0xff]  ;;  %v410_v48 = vld [vmem:[%s2940_s2 + $0xe0] sm:$0xff]  ;;  %v413_v49 = vld [vmem:[%s2940_s2 + $0xf8] sm:$0xff] }
  0x15   : > { %781 = vmatpush1.bf16.msra.mxu0 %v487_v14  ;;  %523 = vperm.xlu0 %2184, %v388_v19   ;;  %v412_v50 = vld [vmem:[%s2940_s2 + $0xf0] sm:$0xff]  ;;  %v415_v52 = vld [vmem:[%s2942_s4 + $0x8] sm:$0xff]  ;;  %v414_v53 = vld [vmem:[%s2942_s4] sm:$0xff] }
  0x16   : > { %782 = vmatprep.subr.bf16.mxu0 %v490_v15  ;;  %v2192_v51 = vld [vmem:[%s2939_s1 + $0x30] sm:$0xff]   ;;  %v417_v54 = vld [vmem:[%s2942_s4 + $0x18] sm:$0xff]  ;;  %v419_v57 = vld [vmem:[%s2942_s4 + $0x28] sm:$0xff] }
  0x17   : > { %v416_v55 = vld [vmem:[%s2942_s4 + $0x10] sm:$0xff]  ;;  %v2193_v56 = vld [vmem:[%s2939_s1 + $0x38] sm:$0xff]   ;;  %v418_v58 = vld [vmem:[%s2942_s4 + $0x20] sm:$0xff] }
  0x18   : > { %538 = vperm.xlu1 %2185, %v391_v22   ;;  %v421_v59 = vld [vmem:[%s2942_s4 + $0x38] sm:$0xff]  ;;  %v420_v60 = vld [vmem:[%s2942_s4 + $0x30] sm:$0xff]  ;;  %v2194_v61 = vld [vmem:[%s2939_s1 + $0x40] sm:$0xff]  }
  0x19   : > { %783 = vmatpush1.bf16.msra.mxu0 %v489_v20  ;;  %533 = vperm.xlu0 %2184, %v390_v23   ;;  %v423_v62 = vld [vmem:[%s2942_s4 + $0x48] sm:$0xff]  ;;  %v422_v63 = vld [vmem:[%s2942_s4 + $0x40] sm:$0xff]  ;;  %v425_v0 = vld [vmem:[%s2942_s4 + $0x58] sm:$0xff] }
  0x1a   : > { %v424_v1 = vld [vmem:[%s2942_s4 + $0x50] sm:$0xff]  ;;  %v2195_v3 = vld [vmem:[%s2939_s1 + $0x48] sm:$0xff]   ;;  %v426_v5 = vld [vmem:[%s2942_s4 + $0x60] sm:$0xff] }
  0x1b   : > { %v427_v4 = vld [vmem:[%s2942_s4 + $0x68] sm:$0xff]  ;;  %v429_v6 = vld [vmem:[%s2942_s4 + $0x78] sm:$0xff]  ;;  %v428_v7 = vld [vmem:[%s2942_s4 + $0x70] sm:$0xff] }
  0x1c   : > { %2075 = vmatmul.mubr.msk.bf16.vlgmr.msra.gmra.mrb[0].mxu0 %vm731_vm0, %v2186_v21  ;;  %548 = vperm.xlu1 %2185, %v393_v24   ;;  %v2196_v8 = vld [vmem:[%s2939_s1 + $0x50] sm:$0xff]   ;;  %v431_v9 = vld [vmem:[%s2942_s4 + $0x88] sm:$0xff]  ;;  %v430_v10 = vld [vmem:[%s2942_s4 + $0x80] sm:$0xff] }
  0x1d   : > { %822 = vmatprep.mubr.bf16.mxu0 %v2274_v2  ;;  %543 = vperm.xlu0 %2184, %v392_v25   ;;  %v433_v11 = vld [vmem:[%s2942_s4 + $0x98] sm:$0xff]  ;;  %v432_v12 = vld [vmem:[%s2942_s4 + $0x90] sm:$0xff]  ;;  %v435_v14 = vld [vmem:[%s2942_s4 + $0xa8] sm:$0xff] }
  0x1e   : > { %v2197_v13 = vld [vmem:[%s2939_s1 + $0x58] sm:$0xff]   ;;  %v434_v15 = vld [vmem:[%s2942_s4 + $0xa0] sm:$0xff]  ;;  %v436_v17 = vld [vmem:[%s2942_s4 + $0xb0] sm:$0xff] }
  0x1f   : > { %v437_v16 = vld [vmem:[%s2942_s4 + $0xb8] sm:$0xff]  ;;  %v2198_v18 = vld [vmem:[%s2939_s1 + $0x60] sm:$0xff]   ;;  %v439_v19 = vld [vmem:[%s2942_s4 + $0xc8] sm:$0xff] }
  0x20   : > { %558 = vperm.xlu1 %2185, %v395_v27   ;;  %v438_v20 = vld [vmem:[%s2942_s4 + $0xc0] sm:$0xff]  ;;  %v440_v22 = vld [vmem:[%s2942_s4 + $0xd0] sm:$0xff]  ;;  %v2199_v23 = vld [vmem:[%s2939_s1 + $0x68] sm:$0xff]  }
  0x21   : > { %553 = vperm.xlu0 %2184, %v394_v28   ;;  %v446_v21 = vld [vmem:[%s2943_s5] sm:$0xff]  ;;  %v448_v24 = vld [vmem:[%s2943_s5 + $0x10] sm:$0xff]  ;;  %v447_v25 = vld [vmem:[%s2943_s5 + $0x8] sm:$0xff] }
  0x22   : > { %v449_v27 = vld [vmem:[%s2943_s5 + $0x18] sm:$0xff]  ;;  %v2200_v28 = vld [vmem:[%s2939_s1 + $0x70] sm:$0xff]  }
  0x24   : > { %2076 = vmatmul.mubr.msk.bf16.gmra.mrb[4].mxu0 %vm731_vm0, %v2187_v26  ;;  %568 = vperm.xlu1 %2185, %v397_v29   ;;  %v450_v26 = vld [vmem:[%s2943_s5 + $0x20] sm:$0xff]  ;;  %v452_v29 = vld [vmem:[%s2943_s5 + $0x30] sm:$0xff] }
  0x25   : > { %832 = vmatprep.mubr.bf16.mxu0 %v2274_v2  ;;  %563 = vperm.xlu0 %2184, %v396_v30   ;;  %v451_v30 = vld [vmem:[%s2943_s5 + $0x28] sm:$0xff] }
  0x28   : > { %578 = vperm.xlu1 %2185, %v399_v32   ;;  %v453_v32 = vld [vmem:[%s2943_s5 + $0x38] sm:$0xff] }
  0x29   : > { %573 = vperm.xlu0 %2184, %v398_v33   ;;  %v2201_v33 = vld [vmem:[%s2939_s1 + $0x78] sm:$0xff]  }
  0x2c   : > { %2077 = vmatmul.mubr.msk.bf16.gmra.mrb[8].mxu0 %vm731_vm0, %v2188_v31  ;;  %588 = vperm.xlu1 %2185, %v401_v34   ;;  %v454_v31 = vld [vmem:[%s2943_s5 + $0x40] sm:$0xff]  ;;  %v456_v34 = vld [vmem:[%s2943_s5 + $0x50] sm:$0xff] }
  0x2d   : > { %842 = vmatprep.mubr.bf16.mxu0 %v2274_v2  ;;  %583 = vperm.xlu0 %2184, %v400_v35   ;;  %v455_v35 = vld [vmem:[%s2943_s5 + $0x48] sm:$0xff] }
  0x30   : > { %598 = vperm.xlu1 %2185, %v403_v37   ;;  %v460_v37 = vld [vmem:[%s2943_s5 + $0x70] sm:$0xff] }
  0x31   : > { %593 = vperm.xlu0 %2184, %v402_v38   ;;  %v459_v38 = vld [vmem:[%s2943_s5 + $0x68] sm:$0xff] }
  0x34   : > { %2078 = vmatmul.mubr.msk.bf16.gmra.mrb[12].mxu0 %vm731_vm0, %v2189_v36  ;;  %608 = vperm.xlu1 %2185, %v405_v39   ;;  %v457_v36 = vld [vmem:[%s2943_s5 + $0x58] sm:$0xff]  ;;  %v462_v39 = vld [vmem:[%s2943_s5 + $0x80] sm:$0xff] }
  0x35   : > { %852 = vmatprep.mubr.bf16.mxu0 %v2274_v2  ;;  %603 = vperm.xlu0 %2184, %v404_v40   ;;  %v461_v40 = vld [vmem:[%s2943_s5 + $0x78] sm:$0xff] }
  0x38   : > { %618 = vperm.xlu1 %2185, %v407_v42   ;;  %v463_v42 = vld [vmem:[%s2943_s5 + $0x88] sm:$0xff] }
  0x39   : > { %613 = vperm.xlu0 %2184, %v406_v43   ;;  %v466_v43 = vld [vmem:[%s2943_s5 + $0xa0] sm:$0xff] }
  0x3c   : > { %2079 = vmatmul.mubr.msk.bf16.gmra.mrb[16].mxu0 %vm731_vm0, %v2190_v41  ;;  %628 = vperm.xlu1 %2185, %v409_v44   ;;  %v464_v41 = vld [vmem:[%s2943_s5 + $0x90] sm:$0xff]  ;;  %v465_v44 = vld [vmem:[%s2943_s5 + $0x98] sm:$0xff] }
  0x3d   : > { %862 = vmatprep.mubr.bf16.mxu0 %v2274_v2  ;;  %623 = vperm.xlu0 %2184, %v408_v45   ;;  %v468_v45 = vld [vmem:[%s2943_s5 + $0xb0] sm:$0xff] }
  0x40   : > { %638 = vperm.xlu1 %2185, %v411_v47   ;;  %v470_v47 = vld [vmem:[%s2943_s5 + $0xc0] sm:$0xff] }
  0x41   : > { %633 = vperm.xlu0 %2184, %v410_v48   ;;  %v469_v48 = vld [vmem:[%s2943_s5 + $0xb8] sm:$0xff] }
  0x44   : > { %2080 = vmatmul.mubr.msk.bf16.gmra.mrb[20].mxu0 %vm731_vm0, %v2191_v46  ;;  %648 = vperm.xlu1 %2185, %v413_v49   ;;  %v467_v46 = vld [vmem:[%s2943_s5 + $0xa8] sm:$0xff] }
  0x45   : > { %872 = vmatprep.mubr.bf16.mxu0 %v2274_v2  ;;  %643 = vperm.xlu0 %2184, %v412_v50   ;;  %v471_v49 = vld [vmem:[%s2943_s5 + $0xc8] sm:$0xff]  ;;  %v441_v50 = vld [vmem:[%s2942_s4 + $0xd8] sm:$0xff] }
  0x48   : > { %1076 = vperm.xlu1 %2185, %v415_v52   ;;  %v442_v52 = vld [vmem:[%s2942_s4 + $0xe0] sm:$0xff] }
  0x49   : > { %1071 = vperm.xlu0 %2184, %v414_v53   ;;  %v473_v53 = vld [vmem:[%s2943_s5 + $0xd8] sm:$0xff] }
  0x4c   : > { %2081 = vmatmul.mubr.msk.bf16.gmra.mrb[24].mxu0 %vm731_vm0, %v2192_v51  ;;  %1086 = vperm.xlu1 %2185, %v417_v54   ;;  %v472_v51 = vld [vmem:[%s2943_s5 + $0xd0] sm:$0xff]  ;;  %v443_v54 = vld [vmem:[%s2942_s4 + $0xe8] sm:$0xff] }
  0x4d   : > { %882 = vmatprep.mubr.bf16.mxu0 %v2274_v2  ;;  %1081 = vperm.xlu0 %2184, %v416_v55   ;;  %v474_v55 = vld [vmem:[%s2943_s5 + $0xe0] sm:$0xff] }
  0x50   : > { %1096 = vperm.xlu1 %2185, %v419_v57   ;;  %v475_v57 = vld [vmem:[%s2943_s5 + $0xe8] sm:$0xff] }
  0x51   : > { %1091 = vperm.xlu0 %2184, %v418_v58   ;;  %v445_v58 = vld [vmem:[%s2942_s4 + $0xf8] sm:$0xff] }
  0x54   : > { %2082 = vmatmul.mubr.msk.bf16.gmra.mrb[28].mxu0 %vm731_vm0, %v2193_v56  ;;  %1106 = vperm.xlu1 %2185, %v421_v59   ;;  %v444_v56 = vld [vmem:[%s2942_s4 + $0xf0] sm:$0xff]  ;;  %v477_v59 = vld [vmem:[%s2943_s5 + $0xf8] sm:$0xff] }
  0x55   : > { %892 = vmatprep.mubr.bf16.mxu0 %v2274_v2  ;;  %1101 = vperm.xlu0 %2184, %v420_v60   ;;  %v476_v60 = vld [vmem:[%s2943_s5 + $0xf0] sm:$0xff] }
  0x58   : > { %1116 = vperm.xlu1 %2185, %v423_v62  }
  0x59   : > { %1111 = vperm.xlu0 %2184, %v422_v63  }
  0x5c   : > { %2083 = vmatmul.mubr.msk.bf16.gmra.mrb[32].mxu0 %vm731_vm0, %v2194_v61  ;;  %1126 = vperm.xlu1 %2185, %v425_v0  }
  0x5d   : > { %902 = vmatprep.mubr.bf16.mxu0 %v2274_v2  ;;  %1121 = vperm.xlu0 %2184, %v424_v1  }
  0x60   : > { %1136 = vperm.xlu1 %2185, %v427_v4  }
  0x61   : > { %1131 = vperm.xlu0 %2184, %v426_v5  }
  0x64   : > { %2084 = vmatmul.mubr.msk.bf16.gmra.mrb[36].mxu0 %vm731_vm0, %v2195_v3  ;;  %1146 = vperm.xlu1 %2185, %v429_v6  }
  0x65   : > { %912 = vmatprep.mubr.bf16.mxu0 %v2274_v2  ;;  %1141 = vperm.xlu0 %2184, %v428_v7   ;;  %v2204_v7 = vld [vmem:[%s2941_s3 + $0x4] ss:$8 sps:$4 sm:$0xff]  }
  0x68   : > { %1156 = vperm.xlu1 %2185, %v431_v9  }
  0x69   : > { %1151 = vperm.xlu0 %2184, %v430_v10   ;;  %v2207_v10 = vld [vmem:[%s2941_s3 + $0x34] ss:$8 sps:$4 sm:$0xff]  }
  0x6a   : > { %1451 = vmatprep.mubr.bf16.mxu1 %v2207_v10 }
  0x6c   : > { %2085 = vmatmul.mubr.msk.bf16.gmra.mrb[40].mxu0 %vm731_vm0, %v2196_v8  ;;  %1166 = vperm.xlu1 %2185, %v433_v11  }
  0x6d   : > { %922 = vmatprep.mubr.bf16.mxu0 %v2274_v2  ;;  %1161 = vperm.xlu0 %2184, %v432_v12  }
  0x70   : > { %1176 = vperm.xlu1 %2185, %v435_v14  }
  0x71   : > { %1171 = vperm.xlu0 %2184, %v434_v15  }
  0x74   : > { %2086 = vmatmul.mubr.msk.bf16.gmra.mrb[44].mxu0 %vm731_vm0, %v2197_v13  ;;  %1186 = vperm.xlu1 %2185, %v437_v16  }
  0x75   : > { %932 = vmatprep.mubr.bf16.mxu0 %v2274_v2  ;;  %1181 = vperm.xlu0 %2184, %v436_v17  }
  0x78   : > { %1196 = vperm.xlu1 %2185, %v439_v19  }
  0x79   : > { %1191 = vperm.xlu0 %2184, %v438_v20  }
  0x7c   : > { %2087 = vmatmul.mubr.msk.bf16.gmra.mrb[48].mxu0 %vm731_vm0, %v2198_v18  ;;  %1648 = vperm.xlu1 %2185, %v446_v21  }
  0x7d   : > { %942 = vmatprep.mubr.bf16.mxu0 %v2274_v2  ;;  %1201 = vperm.xlu0 %2184, %v440_v22  }
  0x80   : > { %1658 = vperm.xlu1 %2185, %v448_v24  }
  0x81   : > { %1653 = vperm.xlu0 %2184, %v447_v25  }
  0x84   : > { %2088 = vmatmul.mubr.msk.bf16.gmra.mrb[52].mxu0 %vm731_vm0, %v2199_v23  ;;  %1668 = vperm.xlu1 %2185, %v450_v26  }
  0x85   : > { %952 = vmatprep.mubr.bf16.mxu0 %v2274_v2  ;;  %1663 = vperm.xlu0 %2184, %v449_v27  }
  0x87   : > { %v494_v61 = vpop.permute.xlu0 %493  ;;  %v504_v8 = vpop.permute.xlu1 %503 }
  0x88   : > { %1678 = vperm.xlu1 %2185, %v452_v29  }
  0x89   : > { %1673 = vperm.xlu0 %2184, %v451_v30  }
  0x8b   : > { %v499_v1 = vpop.permute.xlu0 %498  ;;  %v509_v20 = vpop.permute.xlu1 %508 }
  0x8c   : > { %2089 = vmatmul.mubr.msk.bf16.gmra.mrb[56].mxu0 %vm731_vm0, %v2200_v28  ;;  %1688 = vperm.xlu1 %2185, %v454_v31  }
  0x8d   : > { %962 = vmatprep.mubr.bf16.mxu0 %v2274_v2  ;;  %1683 = vperm.xlu0 %2184, %v453_v32   ;;  %v458_v2 = vld [vmem:[%s2943_s5 + $0x60] sm:$0xff] }
  0x8f   : > { %v514_v31 = vpop.permute.xlu0 %513 }
  0x90   : > { %1698 = vperm.xlu1 %2185, %v456_v34  }
  0x91   : > { %1693 = vperm.xlu0 %2184, %v455_v35  }
  0x94   : > { %2090 = vmatmul.mubr.msk.bf16.gmra.mrb[60].mxu0 %vm731_vm0, %v2201_v33  ;;  %1708 = vperm.xlu1 %2185, %v458_v2   ;;  %v519_v2 = vpop.permute.xlu1 %518 }
  0x95   : > { %1703 = vperm.xlu0 %2184, %v457_v36   ;;  %1421 = vmatprep.mubr.bf16.mxu0 %v2204_v7 }
  0x98   : > { %1718 = vperm.xlu1 %2185, %v460_v37  }
  0x99   : > { %1713 = vperm.xlu0 %2184, %v459_v38  }
  0x9c   : > { %1728 = vperm.xlu1 %2185, %v462_v39  }
  0x9d   : > { %1723 = vperm.xlu0 %2184, %v461_v40  }
  0xa0   : > { %1738 = vperm.xlu1 %2185, %v464_v41  }
  0xa1   : > { %1733 = vperm.xlu0 %2184, %v463_v42  }
  0xa4   : > { %1748 = vperm.xlu1 %2185, %v466_v43  }
  0xa5   : > { %1743 = vperm.xlu0 %2184, %v465_v44  }
  0xa8   : > { %1758 = vperm.xlu1 %2185, %v468_v45  }
  0xa9   : > { %1753 = vperm.xlu0 %2184, %v467_v46   ;;  %v524_v46 = vpop.permute.xlu0 %523 }
  0xac   : > { %1768 = vperm.xlu1 %2185, %v470_v47  }
  0xad   : > { %1763 = vperm.xlu0 %2184, %v469_v48  }
  0xb0   : > { %1773 = vperm.xlu1 %2185, %v471_v49  }
  0xb1   : > { %1206 = vperm.xlu0 %2184, %v441_v50  }
  0xb4   : > { %1778 = vperm.xlu1 %2185, %v472_v51   ;;  %v529_v51 = vpop.permute.xlu1 %528 }
  0xb5   : > { %1211 = vperm.xlu0 %2184, %v442_v52  }
  0xb8   : > { %1783 = vperm.xlu1 %2185, %v473_v53  }
  0xb9   : > { %1216 = vperm.xlu0 %2184, %v443_v54  }
  0xbc   : > { %1788 = vperm.xlu1 %2185, %v474_v55  }
  0xbd   : > { %1221 = vperm.xlu0 %2184, %v444_v56  }
  0xc0   : > { %1793 = vperm.xlu1 %2185, %v475_v57  }
  0xc1   : > { %1226 = vperm.xlu0 %2184, %v445_v58  }
  0xc4   : > { %1803 = vperm.xlu1 %2185, %v477_v59  }
  0xc5   : > { %1798 = vperm.xlu0 %2184, %v476_v60  }
  0xef   : > { %v814_v62 = vpop.f32.mrb[0].mxu0 }
  0xf0   : > { %v815_v63 = vadd.f32 %v814_v62, %v494_v61  ;;  %v816_v0 = vpop.f32.mrb[1].mxu0  ;;  %v534_v62 = vpop.permute.xlu0 %533 }
  0xf1   : > { %v817_v3 = vadd.f32 %v816_v0, %v494_v61  ;;  %v818_v4 = vpop.f32.mrb[2].mxu0 }
  0xf2   : > { %v819_v5 = vadd.f32 %v818_v4, %v499_v1  ;;  %v820_v6 = vpop.f32.mrb[3].mxu0  ;;  %v973_v11 = vmax.f32 %v815_v63, 0.0  ;;  %v539_v4 = vpop.permute.xlu1 %538 }
  0xf3   : > { %v821_v9 = vadd.f32 %v820_v6, %v499_v1  ;;  %v974_v13 = vmax.f32 %v817_v3, 0.0 }
  0xf4   : > { %v975_v12 = vmax.f32 %v819_v5, 0.0 }
  0xf5   : > { %v976_v14 = vmax.f32 %v821_v9, 0.0 }
  0xf6   : > { %v1037_v15 = vpack.c.bf16 %v975_v12, %v973_v11 }
  0xf7   : > { %v1038_v16 = vpack.c.bf16 %v976_v14, %v974_v13  ;;  %v824_v17 = vpop.f32.mrb[4].mxu0 }
  0xf8   : > { %v825_v18 = vadd.f32 %v824_v17, %v504_v8  ;;  %v826_v19 = vpop.f32.mrb[5].mxu0 }
  0xf9   : > { %v827_v21 = vadd.f32 %v826_v19, %v504_v8  ;;  %v828_v22 = vpop.f32.mrb[6].mxu0  ;;  %1389 = vmatprep.subr.bf16.mxu0 %v1038_v16  ;;  %2126 = vmatprep.subr.bf16.mxu1 %v1038_v16 }
  0xfa   : > { %v829_v23 = vadd.f32 %v828_v22, %v509_v20  ;;  %v830_v24 = vpop.f32.mrb[7].mxu0  ;;  %1390 = vmatpush1.bf16.msra.mxu0 %v1037_v15  ;;  %2142 = vmatpush1.bf16.msra.mxu1 %v1037_v15  ;;  %v977_v26 = vmax.f32 %v825_v18, 0.0  ;;  %v544_v15 = vpop.permute.xlu0 %543 }
  0xfb   : > { %v831_v25 = vadd.f32 %v830_v24, %v509_v20  ;;  %v978_v28 = vmax.f32 %v827_v21, 0.0  ;;  %v549_v20 = vpop.permute.xlu1 %548 }
  0xfc   : > { %v979_v27 = vmax.f32 %v829_v23, 0.0 }
  0xfd   : > { %v980_v29 = vmax.f32 %v831_v25, 0.0 }
  0xfe   : > { %v1039_v30 = vpack.c.bf16 %v979_v27, %v977_v26 }
  0xff   : > { %v1040_v32 = vpack.c.bf16 %v980_v29, %v978_v28  ;;  %v834_v33 = vpop.f32.mrb[8].mxu0 }
 0x100   : > { %v835_v34 = vadd.f32 %v834_v33, %v514_v31  ;;  %v836_v35 = vpop.f32.mrb[9].mxu0 }
 0x101   : > { %v837_v36 = vadd.f32 %v836_v35, %v514_v31  ;;  %v838_v37 = vpop.f32.mrb[10].mxu0  ;;  %1391 = vmatprep.subr.bf16.mxu0 %v1040_v32  ;;  %2127 = vmatprep.subr.bf16.mxu1 %v1040_v32  ;;  %v554_v31 = vpop.permute.xlu0 %553 }
 0x102   : > { %v839_v38 = vadd.f32 %v838_v37, %v519_v2  ;;  %v840_v39 = vpop.f32.mrb[11].mxu0  ;;  %1392 = vmatpush1.bf16.msra.mxu0 %v1039_v30  ;;  %2143 = vmatpush1.bf16.msra.mxu1 %v1039_v30  ;;  %v981_v41 = vmax.f32 %v835_v34, 0.0 }
 0x103   : > { %v841_v40 = vadd.f32 %v840_v39, %v519_v2  ;;  %v982_v43 = vmax.f32 %v837_v36, 0.0  ;;  %v559_v2 = vpop.permute.xlu1 %558 }
 0x104   : > { %v983_v42 = vmax.f32 %v839_v38, 0.0 }
 0x105   : > { %v984_v44 = vmax.f32 %v841_v40, 0.0 }
 0x106   : > { %v1041_v45 = vpack.c.bf16 %v983_v42, %v981_v41 }
 0x107   : > { %v1042_v47 = vpack.c.bf16 %v984_v44, %v982_v43  ;;  %v844_v48 = vpop.f32.mrb[12].mxu0 }
 0x108   : > { %v845_v49 = vadd.f32 %v844_v48, %v524_v46  ;;  %v846_v50 = vpop.f32.mrb[13].mxu0 }
 0x109   : > { %v847_v52 = vadd.f32 %v846_v50, %v524_v46  ;;  %v848_v53 = vpop.f32.mrb[14].mxu0  ;;  %1393 = vmatprep.subr.bf16.mxu0 %v1042_v47  ;;  %2128 = vmatprep.subr.bf16.mxu1 %v1042_v47  ;;  %v564_v46 = vpop.permute.xlu0 %563 }
 0x10a   : > { %v849_v54 = vadd.f32 %v848_v53, %v529_v51  ;;  %v850_v55 = vpop.f32.mrb[15].mxu0  ;;  %1394 = vmatpush1.bf16.msra.mxu0 %v1041_v45  ;;  %2144 = vmatpush1.bf16.msra.mxu1 %v1041_v45  ;;  %v985_v57 = vmax.f32 %v845_v49, 0.0 }
 0x10b   : > { %v851_v56 = vadd.f32 %v850_v55, %v529_v51  ;;  %v986_v59 = vmax.f32 %v847_v52, 0.0  ;;  %v569_v51 = vpop.permute.xlu1 %568 }
 0x10c   : > { %v987_v58 = vmax.f32 %v849_v54, 0.0 }
 0x10d   : > { %v988_v60 = vmax.f32 %v851_v56, 0.0 }
 0x10e   : > { %v1043_v61 = vpack.c.bf16 %v987_v58, %v985_v57 }
 0x10f   : > { %v1044_v63 = vpack.c.bf16 %v988_v60, %v986_v59  ;;  %v854_v0 = vpop.f32.mrb[16].mxu0 }
 0x110   : > { %v855_v1 = vadd.f32 %v854_v0, %v534_v62  ;;  %v856_v3 = vpop.f32.mrb[17].mxu0 }
 0x111   : > { %v857_v5 = vadd.f32 %v856_v3, %v534_v62  ;;  %v858_v6 = vpop.f32.mrb[18].mxu0  ;;  %1395 = vmatprep.subr.bf16.mxu0 %v1044_v63  ;;  %2129 = vmatprep.subr.bf16.mxu1 %v1044_v63  ;;  %v574_v62 = vpop.permute.xlu0 %573 }
 0x112   : > { %v859_v7 = vadd.f32 %v858_v6, %v539_v4  ;;  %v860_v8 = vpop.f32.mrb[19].mxu0  ;;  %1396 = vmatpush1.bf16.msra.mxu0 %v1043_v61  ;;  %2145 = vmatpush1.bf16.msra.mxu1 %v1043_v61  ;;  %v989_v10 = vmax.f32 %v855_v1, 0.0 }
 0x113   : > { %v861_v9 = vadd.f32 %v860_v8, %v539_v4  ;;  %v990_v12 = vmax.f32 %v857_v5, 0.0  ;;  %v579_v4 = vpop.permute.xlu1 %578 }
 0x114   : > { %v991_v11 = vmax.f32 %v859_v7, 0.0 }
 0x115   : > { %v992_v13 = vmax.f32 %v861_v9, 0.0 }
 0x116   : > { %v1045_v14 = vpack.c.bf16 %v991_v11, %v989_v10 }
 0x117   : > { %v1046_v16 = vpack.c.bf16 %v992_v13, %v990_v12  ;;  %v864_v17 = vpop.f32.mrb[20].mxu0 }
 0x118   : > { %v865_v18 = vadd.f32 %v864_v17, %v544_v15  ;;  %v866_v19 = vpop.f32.mrb[21].mxu0 }
 0x119   : > { %v867_v21 = vadd.f32 %v866_v19, %v544_v15  ;;  %v868_v22 = vpop.f32.mrb[22].mxu0  ;;  %1397 = vmatprep.subr.bf16.mxu0 %v1046_v16  ;;  %2130 = vmatprep.subr.bf16.mxu1 %v1046_v16  ;;  %v584_v15 = vpop.permute.xlu0 %583 }
 0x11a   : > { %v869_v23 = vadd.f32 %v868_v22, %v549_v20  ;;  %v870_v24 = vpop.f32.mrb[23].mxu0  ;;  %1398 = vmatpush1.bf16.msra.mxu0 %v1045_v14  ;;  %2146 = vmatpush1.bf16.msra.mxu1 %v1045_v14  ;;  %v993_v26 = vmax.f32 %v865_v18, 0.0 }
 0x11b   : > { %v871_v25 = vadd.f32 %v870_v24, %v549_v20  ;;  %v994_v28 = vmax.f32 %v867_v21, 0.0  ;;  %v589_v20 = vpop.permute.xlu1 %588 }
 0x11c   : > { %v995_v27 = vmax.f32 %v869_v23, 0.0 }
 0x11d   : > { %v996_v29 = vmax.f32 %v871_v25, 0.0 }
 0x11e   : > { %v1047_v30 = vpack.c.bf16 %v995_v27, %v993_v26 }
 0x11f   : > { %v1048_v32 = vpack.c.bf16 %v996_v29, %v994_v28  ;;  %v874_v33 = vpop.f32.mrb[24].mxu0 }
 0x120   : > { %v875_v34 = vadd.f32 %v874_v33, %v554_v31  ;;  %v876_v35 = vpop.f32.mrb[25].mxu0 }
 0x121   : > { %v877_v36 = vadd.f32 %v876_v35, %v554_v31  ;;  %v878_v37 = vpop.f32.mrb[26].mxu0  ;;  %1399 = vmatprep.subr.bf16.mxu0 %v1048_v32  ;;  %2131 = vmatprep.subr.bf16.mxu1 %v1048_v32  ;;  %v594_v31 = vpop.permute.xlu0 %593 }
 0x122   : > { %v879_v38 = vadd.f32 %v878_v37, %v559_v2  ;;  %v880_v39 = vpop.f32.mrb[27].mxu0  ;;  %1400 = vmatpush1.bf16.msra.mxu0 %v1047_v30  ;;  %2147 = vmatpush1.bf16.msra.mxu1 %v1047_v30  ;;  %v997_v41 = vmax.f32 %v875_v34, 0.0 }
 0x123   : > { %v881_v40 = vadd.f32 %v880_v39, %v559_v2  ;;  %v998_v43 = vmax.f32 %v877_v36, 0.0  ;;  %v599_v2 = vpop.permute.xlu1 %598 }
 0x124   : > { %v999_v42 = vmax.f32 %v879_v38, 0.0 }
 0x125   : > { %v1000_v44 = vmax.f32 %v881_v40, 0.0 }
 0x126   : > { %v1049_v45 = vpack.c.bf16 %v999_v42, %v997_v41 }
 0x127   : > { %v1050_v47 = vpack.c.bf16 %v1000_v44, %v998_v43  ;;  %v884_v48 = vpop.f32.mrb[28].mxu0 }
 0x128   : > { %v885_v49 = vadd.f32 %v884_v48, %v564_v46  ;;  %v886_v50 = vpop.f32.mrb[29].mxu0 }
 0x129   : > { %v887_v52 = vadd.f32 %v886_v50, %v564_v46  ;;  %v888_v53 = vpop.f32.mrb[30].mxu0  ;;  %1401 = vmatprep.subr.bf16.mxu0 %v1050_v47  ;;  %2132 = vmatprep.subr.bf16.mxu1 %v1050_v47  ;;  %v604_v46 = vpop.permute.xlu0 %603 }
 0x12a   : > { %v889_v54 = vadd.f32 %v888_v53, %v569_v51  ;;  %v890_v55 = vpop.f32.mrb[31].mxu0  ;;  %1402 = vmatpush1.bf16.msra.mxu0 %v1049_v45  ;;  %2148 = vmatpush1.bf16.msra.mxu1 %v1049_v45  ;;  %v1001_v57 = vmax.f32 %v885_v49, 0.0 }
 0x12b   : > { %v891_v56 = vadd.f32 %v890_v55, %v569_v51  ;;  %v1002_v59 = vmax.f32 %v887_v52, 0.0  ;;  %v609_v51 = vpop.permute.xlu1 %608 }
 0x12c   : > { %v1003_v58 = vmax.f32 %v889_v54, 0.0 }
 0x12d   : > { %v1004_v60 = vmax.f32 %v891_v56, 0.0 }
 0x12e   : > { %v1051_v61 = vpack.c.bf16 %v1003_v58, %v1001_v57 }
 0x12f   : > { %v1052_v63 = vpack.c.bf16 %v1004_v60, %v1002_v59  ;;  %v894_v0 = vpop.f32.mrb[32].mxu0 }
 0x130   : > { %v895_v1 = vadd.f32 %v894_v0, %v574_v62  ;;  %v896_v3 = vpop.f32.mrb[33].mxu0 }
 0x131   : > { %v897_v5 = vadd.f32 %v896_v3, %v574_v62  ;;  %v898_v6 = vpop.f32.mrb[34].mxu0  ;;  %1403 = vmatprep.subr.bf16.mxu0 %v1052_v63  ;;  %2133 = vmatprep.subr.bf16.mxu1 %v1052_v63  ;;  %v614_v62 = vpop.permute.xlu0 %613 }
 0x132   : > { %v899_v7 = vadd.f32 %v898_v6, %v579_v4  ;;  %v900_v8 = vpop.f32.mrb[35].mxu0  ;;  %1404 = vmatpush1.bf16.msra.mxu0 %v1051_v61  ;;  %2149 = vmatpush1.bf16.msra.mxu1 %v1051_v61  ;;  %v1005_v10 = vmax.f32 %v895_v1, 0.0 }
 0x133   : > { %v901_v9 = vadd.f32 %v900_v8, %v579_v4  ;;  %v1006_v12 = vmax.f32 %v897_v5, 0.0  ;;  %v619_v4 = vpop.permute.xlu1 %618 }
 0x134   : > { %v1007_v11 = vmax.f32 %v899_v7, 0.0 }
 0x135   : > { %v1008_v13 = vmax.f32 %v901_v9, 0.0 }
 0x136   : > { %v1053_v14 = vpack.c.bf16 %v1007_v11, %v1005_v10 }
 0x137   : > { %v1054_v16 = vpack.c.bf16 %v1008_v13, %v1006_v12  ;;  %v904_v17 = vpop.f32.mrb[36].mxu0 }
 0x138   : > { %v905_v18 = vadd.f32 %v904_v17, %v584_v15  ;;  %v906_v19 = vpop.f32.mrb[37].mxu0 }
 0x139   : > { %v907_v21 = vadd.f32 %v906_v19, %v584_v15  ;;  %v908_v22 = vpop.f32.mrb[38].mxu0  ;;  %1405 = vmatprep.subr.bf16.mxu0 %v1054_v16  ;;  %2134 = vmatprep.subr.bf16.mxu1 %v1054_v16  ;;  %v624_v15 = vpop.permute.xlu0 %623 }
 0x13a   : > { %v909_v23 = vadd.f32 %v908_v22, %v589_v20  ;;  %v910_v24 = vpop.f32.mrb[39].mxu0  ;;  %1406 = vmatpush1.bf16.msra.mxu0 %v1053_v14  ;;  %2150 = vmatpush1.bf16.msra.mxu1 %v1053_v14  ;;  %v1009_v26 = vmax.f32 %v905_v18, 0.0 }
 0x13b   : > { %v911_v25 = vadd.f32 %v910_v24, %v589_v20  ;;  %v1010_v28 = vmax.f32 %v907_v21, 0.0  ;;  %v629_v20 = vpop.permute.xlu1 %628 }
 0x13c   : > { %v1011_v27 = vmax.f32 %v909_v23, 0.0 }
 0x13d   : > { %v1012_v29 = vmax.f32 %v911_v25, 0.0 }
 0x13e   : > { %v1055_v30 = vpack.c.bf16 %v1011_v27, %v1009_v26 }
 0x13f   : > { %v1056_v32 = vpack.c.bf16 %v1012_v29, %v1010_v28  ;;  %v914_v33 = vpop.f32.mrb[40].mxu0 }
 0x140   : > { %v915_v34 = vadd.f32 %v914_v33, %v594_v31  ;;  %v916_v35 = vpop.f32.mrb[41].mxu0 }
 0x141   : > { %v917_v36 = vadd.f32 %v916_v35, %v594_v31  ;;  %v918_v37 = vpop.f32.mrb[42].mxu0  ;;  %1407 = vmatprep.subr.bf16.mxu0 %v1056_v32  ;;  %2135 = vmatprep.subr.bf16.mxu1 %v1056_v32  ;;  %v634_v31 = vpop.permute.xlu0 %633 }
 0x142   : > { %v919_v38 = vadd.f32 %v918_v37, %v599_v2  ;;  %v920_v39 = vpop.f32.mrb[43].mxu0  ;;  %1408 = vmatpush1.bf16.msra.mxu0 %v1055_v30  ;;  %2151 = vmatpush1.bf16.msra.mxu1 %v1055_v30  ;;  %v1013_v41 = vmax.f32 %v915_v34, 0.0 }
 0x143   : > { %v921_v40 = vadd.f32 %v920_v39, %v599_v2  ;;  %v1014_v43 = vmax.f32 %v917_v36, 0.0  ;;  %v639_v2 = vpop.permute.xlu1 %638 }
 0x144   : > { %v1015_v42 = vmax.f32 %v919_v38, 0.0 }
 0x145   : > { %v1016_v44 = vmax.f32 %v921_v40, 0.0 }
 0x146   : > { %v1057_v45 = vpack.c.bf16 %v1015_v42, %v1013_v41 }
 0x147   : > { %v1058_v47 = vpack.c.bf16 %v1016_v44, %v1014_v43  ;;  %v924_v48 = vpop.f32.mrb[44].mxu0 }
 0x148   : > { %v925_v49 = vadd.f32 %v924_v48, %v604_v46  ;;  %v926_v50 = vpop.f32.mrb[45].mxu0 }
 0x149   : > { %v927_v52 = vadd.f32 %v926_v50, %v604_v46  ;;  %v928_v53 = vpop.f32.mrb[46].mxu0  ;;  %1409 = vmatprep.subr.bf16.mxu0 %v1058_v47  ;;  %2136 = vmatprep.subr.bf16.mxu1 %v1058_v47  ;;  %v644_v46 = vpop.permute.xlu0 %643 }
 0x14a   : > { %v929_v54 = vadd.f32 %v928_v53, %v609_v51  ;;  %v930_v55 = vpop.f32.mrb[47].mxu0  ;;  %1410 = vmatpush1.bf16.msra.mxu0 %v1057_v45  ;;  %2152 = vmatpush1.bf16.msra.mxu1 %v1057_v45  ;;  %v1017_v57 = vmax.f32 %v925_v49, 0.0 }
 0x14b   : > { %v931_v56 = vadd.f32 %v930_v55, %v609_v51  ;;  %v1018_v59 = vmax.f32 %v927_v52, 0.0  ;;  %v649_v51 = vpop.permute.xlu1 %648 }
 0x14c   : > { %v1019_v58 = vmax.f32 %v929_v54, 0.0 }
 0x14d   : > { %v1020_v60 = vmax.f32 %v931_v56, 0.0 }
 0x14e   : > { %v1059_v61 = vpack.c.bf16 %v1019_v58, %v1017_v57 }
 0x14f   : > { %v1060_v63 = vpack.c.bf16 %v1020_v60, %v1018_v59  ;;  %v934_v0 = vpop.f32.mrb[48].mxu0 }
 0x150   : > { %v935_v1 = vadd.f32 %v934_v0, %v614_v62  ;;  %v936_v3 = vpop.f32.mrb[49].mxu0  ;;  %v2205_v0 = vld [vmem:[%s2941_s3 + $0x30] ss:$8 sps:$4 sm:$0xff]  }
 0x151   : > { %v937_v5 = vadd.f32 %v936_v3, %v614_v62  ;;  %v938_v6 = vpop.f32.mrb[50].mxu0  ;;  %1411 = vmatprep.subr.bf16.mxu0 %v1060_v63  ;;  %2137 = vmatprep.subr.bf16.mxu1 %v1060_v63  ;;  %v2202_v63 = vld [vmem:[%s2941_s3] ss:$8 sps:$4 sm:$0xff]   ;;  %v2210_v3 = vld [vmem:[%s2941_s3 + $0x44] ss:$8 sps:$4 sm:$0xff]  }
 0x152   : > { %v939_v7 = vadd.f32 %v938_v6, %v619_v4  ;;  %v940_v8 = vpop.f32.mrb[51].mxu0  ;;  %1412 = vmatpush1.bf16.msra.mxu0 %v1059_v61  ;;  %2153 = vmatpush1.bf16.msra.mxu1 %v1059_v61  ;;  %v1021_v10 = vmax.f32 %v935_v1, 0.0  ;;  %v2208_v1 = vld [vmem:[%s2941_s3 + $0x14] ss:$8 sps:$4 sm:$0xff]   ;;  %v2214_v6 = vld [vmem:[%s2941_s3 + $0x24] ss:$8 sps:$4 sm:$0xff]  }
 0x153   : > { %v941_v9 = vadd.f32 %v940_v8, %v619_v4  ;;  %v1022_v12 = vmax.f32 %v937_v5, 0.0  ;;  %v2212_v4 = vld [vmem:[%s2941_s3 + $0x10] ss:$8 sps:$4 sm:$0xff]   ;;  %v2213_v5 = vld [vmem:[%s2941_s3 + $0x40] ss:$8 sps:$4 sm:$0xff]  }
 0x154   : > { %v1023_v11 = vmax.f32 %v939_v7, 0.0  ;;  %v2216_v7 = vld [vmem:[%s2941_s3 + $0x54] ss:$8 sps:$4 sm:$0xff]   ;;  %v2218_v8 = vld [vmem:[%s2941_s3 + $0x20] ss:$8 sps:$4 sm:$0xff]  }
 0x155   : > { %v1024_v13 = vmax.f32 %v941_v9, 0.0  ;;  %v2219_v9 = vld [vmem:[%s2941_s3 + $0x50] ss:$8 sps:$4 sm:$0xff]  }
 0x156   : > { %v1061_v14 = vpack.c.bf16 %v1023_v11, %v1021_v10  ;;  %v2220_v10 = vld [vmem:[%s2941_s3 + $0x64] ss:$8 sps:$4 sm:$0xff]   ;;  %v2222_v11 = vld [vmem:[%s2941_s3 + $0x60] ss:$8 sps:$4 sm:$0xff]  }
 0x157   : > { %v1062_v16 = vpack.c.bf16 %v1024_v13, %v1022_v12  ;;  %v944_v17 = vpop.f32.mrb[52].mxu0  ;;  %v2223_v12 = vld [vmem:[%s2941_s3 + $0x74] ss:$8 sps:$4 sm:$0xff]   ;;  %v2225_v13 = vld [vmem:[%s2941_s3 + $0x70] ss:$8 sps:$4 sm:$0xff]  }
 0x158   : > { %v945_v18 = vadd.f32 %v944_v17, %v624_v15  ;;  %v946_v19 = vpop.f32.mrb[53].mxu0  ;;  %v2231_v17 = vld [vmem:[%s2941_s3 + $0x90] ss:$8 sps:$4 sm:$0xff]  }
 0x159   : > { %v947_v21 = vadd.f32 %v946_v19, %v624_v15  ;;  %v948_v22 = vpop.f32.mrb[54].mxu0  ;;  %1413 = vmatprep.subr.bf16.mxu0 %v1062_v16  ;;  %2138 = vmatprep.subr.bf16.mxu1 %v1062_v16  ;;  %v2228_v15 = vld [vmem:[%s2941_s3 + $0x80] ss:$8 sps:$4 sm:$0xff]   ;;  %v2229_v16 = vld [vmem:[%s2941_s3 + $0x94] ss:$8 sps:$4 sm:$0xff]  }
 0x15a   : > { %v949_v23 = vadd.f32 %v948_v22, %v629_v20  ;;  %v950_v24 = vpop.f32.mrb[55].mxu0  ;;  %1414 = vmatpush1.bf16.msra.mxu0 %v1061_v14  ;;  %2154 = vmatpush1.bf16.msra.mxu1 %v1061_v14  ;;  %v1025_v26 = vmax.f32 %v945_v18, 0.0  ;;  %v2226_v14 = vld [vmem:[%s2941_s3 + $0x84] ss:$8 sps:$4 sm:$0xff]   ;;  %v2234_v19 = vld [vmem:[%s2941_s3 + $0xa0] ss:$8 sps:$4 sm:$0xff]  }
 0x15b   : > { %v951_v25 = vadd.f32 %v950_v24, %v629_v20  ;;  %v1026_v28 = vmax.f32 %v947_v21, 0.0  ;;  %v2232_v18 = vld [vmem:[%s2941_s3 + $0xa4] ss:$8 sps:$4 sm:$0xff]   ;;  %v2235_v20 = vld [vmem:[%s2941_s3 + $0xb4] ss:$8 sps:$4 sm:$0xff]  }
 0x15c   : > { %v1027_v27 = vmax.f32 %v949_v23, 0.0  ;;  %v2237_v21 = vld [vmem:[%s2941_s3 + $0xb0] ss:$8 sps:$4 sm:$0xff]   ;;  %v2238_v22 = vld [vmem:[%s2941_s3 + $0xc4] ss:$8 sps:$4 sm:$0xff]  }
 0x15d   : > { %v1028_v29 = vmax.f32 %v951_v25, 0.0  ;;  %v2240_v23 = vld [vmem:[%s2941_s3 + $0xc0] ss:$8 sps:$4 sm:$0xff]   ;;  %v2241_v24 = vld [vmem:[%s2941_s3 + $0xd4] ss:$8 sps:$4 sm:$0xff]  }
 0x15e   : > { %v1063_v30 = vpack.c.bf16 %v1027_v27, %v1025_v26  ;;  %v2243_v25 = vld [vmem:[%s2941_s3 + $0xd0] ss:$8 sps:$4 sm:$0xff]   ;;  %v2244_v26 = vld [vmem:[%s2941_s3 + $0xe4] ss:$8 sps:$4 sm:$0xff]   ;;  %v2246_v27 = vld [vmem:[%s2941_s3 + $0xe0] ss:$8 sps:$4 sm:$0xff]  }
 0x15f   : > { %v1064_v32 = vpack.c.bf16 %v1028_v29, %v1026_v28  ;;  %v954_v33 = vpop.f32.mrb[56].mxu0  ;;  %v2247_v28 = vld [vmem:[%s2941_s3 + $0xf4] ss:$8 sps:$4 sm:$0xff]   ;;  %v2249_v29 = vld [vmem:[%s2941_s3 + $0xf0] ss:$8 sps:$4 sm:$0xff]  }
 0x160   : > { %v955_v34 = vadd.f32 %v954_v33, %v634_v31  ;;  %v956_v35 = vpop.f32.mrb[57].mxu0 }
 0x161   : > { %v957_v36 = vadd.f32 %v956_v35, %v634_v31  ;;  %v958_v37 = vpop.f32.mrb[58].mxu0  ;;  %1415 = vmatprep.subr.bf16.mxu0 %v1064_v32  ;;  %2139 = vmatprep.subr.bf16.mxu1 %v1064_v32  ;;  %v1072_v31 = vpop.permute.xlu0 %1071 }
 0x162   : > { %v959_v38 = vadd.f32 %v958_v37, %v639_v2  ;;  %v960_v39 = vpop.f32.mrb[59].mxu0  ;;  %1416 = vmatpush1.bf16.msra.mxu0 %v1063_v30  ;;  %2155 = vmatpush1.bf16.msra.mxu1 %v1063_v30  ;;  %v1029_v41 = vmax.f32 %v955_v34, 0.0  ;;  %v1077_v30 = vpop.permute.xlu1 %1076 }
 0x163   : > { %v961_v40 = vadd.f32 %v960_v39, %v639_v2  ;;  %v1030_v43 = vmax.f32 %v957_v36, 0.0 }
 0x164   : > { %v1031_v42 = vmax.f32 %v959_v38, 0.0 }
 0x165   : > { %v1032_v44 = vmax.f32 %v961_v40, 0.0  ;;  %v1082_v33 = vpop.permute.xlu0 %1081 }
 0x166   : > { %v1065_v45 = vpack.c.bf16 %v1031_v42, %v1029_v41  ;;  %v2809_v32 = vpop.permute.xlu1 %1086 }
 0x167   : > { %v1066_v47 = vpack.c.bf16 %v1032_v44, %v1030_v43  ;;  %v964_v48 = vpop.f32.mrb[60].mxu0 }
 0x168   : > { %v965_v49 = vadd.f32 %v964_v48, %v644_v46  ;;  %v966_v50 = vpop.f32.mrb[61].mxu0 }
 0x169   : > { %v967_v52 = vadd.f32 %v966_v50, %v644_v46  ;;  %v968_v53 = vpop.f32.mrb[62].mxu0  ;;  %1417 = vmatprep.subr.bf16.mxu0 %v1066_v47  ;;  %2140 = vmatprep.subr.bf16.mxu1 %v1066_v47  ;;  %v2813_v35 = vpop.permute.xlu0 %1091 }
 0x16a   : > { %v969_v54 = vadd.f32 %v968_v53, %v649_v51  ;;  %v970_v55 = vpop.f32.mrb[63].mxu0  ;;  %1418 = vmatpush1.bf16.msra.mxu0 %v1065_v45  ;;  %2156 = vmatpush1.bf16.msra.mxu1 %v1065_v45  ;;  %v1033_v57 = vmax.f32 %v965_v49, 0.0  ;;  %v2811_v34 = vpop.permute.xlu1 %1096 }
 0x16b   : > { %v971_v56 = vadd.f32 %v970_v55, %v649_v51  ;;  %v1034_v59 = vmax.f32 %v967_v52, 0.0 }
 0x16c   : > { %v1035_v58 = vmax.f32 %v969_v54, 0.0 }
 0x16d   : > { %v1036_v60 = vmax.f32 %v971_v56, 0.0  ;;  %v2817_v36 = vpop.permute.xlu0 %1101 }
 0x16e   : > { %v1067_v61 = vpack.c.bf16 %v1035_v58, %v1033_v57  ;;  %v2815_v2 = vpop.permute.xlu1 %1106 }
 0x16f   : > { %v1068_v62 = vpack.c.bf16 %v1036_v60, %v1034_v59 }
 0x171   : > { %1419 = vmatprep.subr.bf16.mxu0 %v1068_v62  ;;  %2141 = vmatprep.subr.bf16.mxu1 %v1068_v62  ;;  %v2821_v38 = vpop.permute.xlu0 %1111 }
 0x172   : > { %1420 = vmatpush1.bf16.msra.mxu0 %v1067_v61  ;;  %2157 = vmatpush1.bf16.msra.mxu1 %v1067_v61  ;;  %v2819_v37 = vpop.permute.xlu1 %1116 }
 0x175   : > { %1422 = vmatmul.mubr.bf16.vlgmr.msra.gmra.mrb[64].mxu0 %v2202_v63  ;;  %1452 = vmatmul.mubr.bf16.vlgmr.msra.gmra.mrb[0].mxu1 %v2205_v0  ;;  %v2825_v40 = vpop.permute.xlu0 %1121 }
 0x176   : > { %1431 = vmatprep.mubr.bf16.mxu0 %v2208_v1  ;;  %1461 = vmatprep.mubr.bf16.mxu1 %v2210_v3  ;;  %v2823_v39 = vpop.permute.xlu1 %1126 }
 0x179   : > { %v2829_v42 = vpop.permute.xlu0 %1131 }
 0x17a   : > { %v2827_v41 = vpop.permute.xlu1 %1136 }
 0x17d   : > { %1432 = vmatmul.mubr.bf16.gmra.mrb[68].mxu0 %v2212_v4  ;;  %1462 = vmatmul.mubr.bf16.gmra.mrb[4].mxu1 %v2213_v5  ;;  %v2833_v44 = vpop.permute.xlu0 %1141 }
 0x17e   : > { %1441 = vmatprep.mubr.bf16.mxu0 %v2214_v6  ;;  %1471 = vmatprep.mubr.bf16.mxu1 %v2216_v7  ;;  %v2831_v43 = vpop.permute.xlu1 %1146 }
 0x181   : > { %v2837_v46 = vpop.permute.xlu0 %1151 }
 0x182   : > { %v2835_v45 = vpop.permute.xlu1 %1156 }
 0x185   : > { %1442 = vmatmul.mubr.bf16.gmra.mrb[72].mxu0 %v2218_v8  ;;  %1472 = vmatmul.mubr.bf16.gmra.mrb[8].mxu1 %v2219_v9  ;;  %v2841_v48 = vpop.permute.xlu0 %1161 }
 0x186   : > { %1481 = vmatprep.mubr.bf16.mxu1 %v2220_v10  ;;  %v2839_v47 = vpop.permute.xlu1 %1166 }
 0x189   : > { %v2845_v50 = vpop.permute.xlu0 %1171 }
 0x18a   : > { %v2843_v49 = vpop.permute.xlu1 %1176 }
 0x18d   : > { %1482 = vmatmul.mubr.bf16.gmra.mrb[12].mxu1 %v2222_v11  ;;  %v2849_v52 = vpop.permute.xlu0 %1181 }
 0x18e   : > { %1491 = vmatprep.mubr.bf16.mxu1 %v2223_v12  ;;  %v2847_v51 = vpop.permute.xlu1 %1186 }
 0x191   : > { %v2853_v54 = vpop.permute.xlu0 %1191 }
 0x192   : > { %v2851_v53 = vpop.permute.xlu1 %1196 }
 0x195   : > { %1492 = vmatmul.mubr.bf16.gmra.mrb[16].mxu1 %v2225_v13  ;;  %v2855_v56 = vpop.permute.xlu0 %1201 }
 0x196   : > { %1501 = vmatprep.mubr.bf16.mxu1 %v2226_v14  ;;  %v1649_v55 = vpop.permute.xlu1 %1648 }
 0x199   : > { %v1654_v58 = vpop.permute.xlu0 %1653 }
 0x19a   : > { %v1659_v57 = vpop.permute.xlu1 %1658 }
 0x19d   : > { %1502 = vmatmul.mubr.bf16.gmra.mrb[20].mxu1 %v2228_v15  ;;  %v1664_v60 = vpop.permute.xlu0 %1663 }
 0x19e   : > { %1511 = vmatprep.mubr.bf16.mxu1 %v2229_v16  ;;  %v2857_v59 = vpop.permute.xlu1 %1668 }
 0x1a1   : > { %v2861_v15 = vpop.permute.xlu0 %1673 }
 0x1a2   : > { %v2859_v14 = vpop.permute.xlu1 %1678 }
 0x1a5   : > { %1512 = vmatmul.mubr.bf16.gmra.mrb[24].mxu1 %v2231_v17 }
 0x1a6   : > { %1521 = vmatprep.mubr.bf16.mxu1 %v2232_v18 }
 0x1ad   : > { %1522 = vmatmul.mubr.bf16.gmra.mrb[28].mxu1 %v2234_v19 }
 0x1ae   : > { %1531 = vmatprep.mubr.bf16.mxu1 %v2235_v20 }
 0x1b5   : > { %1532 = vmatmul.mubr.bf16.gmra.mrb[32].mxu1 %v2237_v21 }
 0x1b6   : > { %1541 = vmatprep.mubr.bf16.mxu1 %v2238_v22 }
 0x1bd   : > { %1542 = vmatmul.mubr.bf16.gmra.mrb[36].mxu1 %v2240_v23 }
 0x1be   : > { %1551 = vmatprep.mubr.bf16.mxu1 %v2241_v24 }
 0x1c5   : > { %1552 = vmatmul.mubr.bf16.gmra.mrb[40].mxu1 %v2243_v25 }
 0x1c6   : > { %1561 = vmatprep.mubr.bf16.mxu1 %v2244_v26 }
 0x1cd   : > { %1562 = vmatmul.mubr.bf16.gmra.mrb[44].mxu1 %v2246_v27 }
 0x1ce   : > { %1571 = vmatprep.mubr.bf16.mxu1 %v2247_v28 }
 0x1d5   : > { %1572 = vmatmul.mubr.bf16.gmra.mrb[48].mxu1 %v2249_v29 }
 0x248   : > { %v1423_v61 = vpop.f32.mrb[64].mxu0  ;;  %v1453_v62 = vpop.f32.mrb[0].mxu1 }
 0x249   : > { %v1424_v63 = vadd.f32 %v1423_v61, %v1072_v31  ;;  %v1425_v0 = vpop.f32.mrb[65].mxu0  ;;  %v1455_v1 = vpop.f32.mrb[1].mxu1 }
 0x24a   : > { %v1426_v3 = vadd.f32 %v1425_v0, %v1072_v31  ;;  %v1427_v4 = vpop.f32.mrb[66].mxu0  ;;  %v1457_v5 = vpop.f32.mrb[2].mxu1 }
 0x24b   : > { %v1582_v6 = vmax.f32 %v1424_v63, 0.0  ;;  %v1428_v7 = vadd.f32 %v1427_v4, %v1077_v30  ;;  %v1429_v8 = vpop.f32.mrb[67].mxu0  ;;  %v1459_v9 = vpop.f32.mrb[3].mxu1 }
 0x24c   : > { %v1583_v10 = vmax.f32 %v1426_v3, 0.0  ;;  %v1430_v11 = vadd.f32 %v1429_v8, %v1077_v30  ;;  %v1684_v8 = vpop.permute.xlu0 %1683 }
 0x24d   : > { %v1584_v12 = vmax.f32 %v1428_v7, 0.0  ;;  %v1806_v16 = vmul.f32 %v1649_v55, %v1582_v6  ;;  %v2865_v7 = vpop.permute.xlu1 %1688 }
 0x24e   : > { %v1585_v13 = vmax.f32 %v1430_v11, 0.0  ;;  %v1807_v18 = vmul.f32 %v1649_v55, %v1583_v10 }
 0x24f   : > { %v1808_v17 = vmul.f32 %v1654_v58, %v1584_v12 }
 0x250   : > { %v1809_v19 = vmul.f32 %v1654_v58, %v1585_v13  ;;  %v1433_v20 = vpop.f32.mrb[68].mxu0  ;;  %v1463_v21 = vpop.f32.mrb[4].mxu1 }
 0x251   : > { %v1870_v22 = vadd.f32 %v1808_v17, %v1806_v16  ;;  %v1434_v23 = vadd.f32 %v1433_v20, %v1082_v33  ;;  %v1435_v24 = vpop.f32.mrb[69].mxu0  ;;  %v1465_v25 = vpop.f32.mrb[5].mxu1  ;;  %v1454_v17 = vadd.f32 %v1453_v62, %v2817_v36  ;;  %v1460_v62 = vadd.f32 %v1459_v9, %v2815_v2 }
 0x252   : > { %v1907_v26 = vadd.f32 %v1809_v19, %v1807_v18  ;;  %v1436_v27 = vadd.f32 %v1435_v24, %v1082_v33  ;;  %v1437_v28 = vpop.f32.mrb[70].mxu0  ;;  %v1467_v29 = vpop.f32.mrb[6].mxu1 }
 0x253   : > { %v1586_v30 = vmax.f32 %v1434_v23, 0.0  ;;  %v1438_v31 = vadd.f32 %v1437_v28, %v2809_v32  ;;  %v1439_v61 = vpop.f32.mrb[71].mxu0  ;;  %v1469_v63 = vpop.f32.mrb[7].mxu1  ;;  %v1456_v23 = vadd.f32 %v1455_v1, %v2817_v36  ;;  %v1594_v36 = vmax.f32 %v1454_v17, 0.0 }
 0x254   : > { %v1587_v0 = vmax.f32 %v1436_v27, 0.0  ;;  %v1440_v3 = vadd.f32 %v1439_v61, %v2809_v32  ;;  %v1464_v1 = vadd.f32 %v1463_v21, %v2821_v38 }
 0x255   : > { %v1810_v55 = vmul.f32 %v1659_v57, %v1586_v30  ;;  %v1588_v58 = vmax.f32 %v1438_v31, 0.0 }
 0x256   : > { %v1811_v4 = vmul.f32 %v1659_v57, %v1587_v0  ;;  %v1589_v6 = vmax.f32 %v1440_v3, 0.0  ;;  %v2875_v3 = vpop.permute.xlu1 %1698 }
 0x257   : > { %v1871_v10 = vadd.f32 %v1870_v22, %v1810_v55  ;;  %v1812_v11 = vmul.f32 %v1664_v60, %v1588_v58  ;;  %v1458_v22 = vadd.f32 %v1457_v5, %v2815_v2  ;;  %v1694_v58 = vpop.permute.xlu0 %1693  ;;  %v1595_v5 = vmax.f32 %v1456_v23, 0.0 }
 0x258   : > { %v1908_v33 = vadd.f32 %v1907_v26, %v1811_v4  ;;  %v1813_v12 = vmul.f32 %v1664_v60, %v1589_v6  ;;  %v1443_v13 = vpop.f32.mrb[72].mxu0  ;;  %v1473_v16 = vpop.f32.mrb[8].mxu1  ;;  %v1466_v4 = vadd.f32 %v1465_v25, %v2821_v38  ;;  %v1468_v2 = vadd.f32 %v1467_v29, %v2819_v37 }
 0x259   : > { %v1872_v18 = vadd.f32 %v1871_v10, %v1812_v11  ;;  %v1444_v19 = vadd.f32 %v1443_v13, %v2813_v35  ;;  %v1445_v20 = vpop.f32.mrb[73].mxu0  ;;  %v1475_v32 = vpop.f32.mrb[9].mxu1  ;;  %v1596_v11 = vmax.f32 %v1458_v22, 0.0  ;;  %v1474_v38 = vadd.f32 %v1473_v16, %v2825_v40 }
 0x25a   : > { %v1909_v57 = vadd.f32 %v1908_v33, %v1813_v12  ;;  %v1446_v24 = vadd.f32 %v1445_v20, %v2813_v35  ;;  %v1447_v27 = vpop.f32.mrb[74].mxu0  ;;  %v1477_v28 = vpop.f32.mrb[10].mxu1  ;;  %v1597_v33 = vmax.f32 %v1460_v62, 0.0  ;;  %v1470_v12 = vadd.f32 %v1469_v63, %v2819_v37 }
 0x25b   : > { %v1590_v26 = vmax.f32 %v1444_v19, 0.0  ;;  %v1448_v60 = vadd.f32 %v1447_v27, %v2811_v34  ;;  %v1449_v30 = vpop.f32.mrb[75].mxu0  ;;  %v1479_v31 = vpop.f32.mrb[11].mxu1  ;;  %v1818_v19 = vmul.f32 %v2859_v14, %v1594_v36  ;;  %v1598_v20 = vmax.f32 %v1464_v1, 0.0 }
 0x25c   : > { %v1591_v61 = vmax.f32 %v1446_v24, 0.0  ;;  %v1450_v0 = vadd.f32 %v1449_v30, %v2811_v34  ;;  %v1819_v23 = vmul.f32 %v2859_v14, %v1595_v5  ;;  %v1599_v29 = vmax.f32 %v1466_v4, 0.0  ;;  %v1709_v22 = vpop.permute.xlu1 %1708 }
 0x25d   : > { %v1814_v35 = vmul.f32 %v2857_v59, %v1590_v26  ;;  %v1592_v55 = vmax.f32 %v1448_v60, 0.0  ;;  %v1820_v37 = vmul.f32 %v1684_v8, %v1596_v11  ;;  %v1600_v63 = vmax.f32 %v1468_v2, 0.0  ;;  %v1704_v60 = vpop.permute.xlu0 %1703 }
 0x25e   : > { %v1815_v6 = vmul.f32 %v2857_v59, %v1591_v61  ;;  %v1593_v10 = vmax.f32 %v1450_v0, 0.0  ;;  %v1821_v30 = vmul.f32 %v1684_v8, %v1597_v33  ;;  %v1601_v62 = vmax.f32 %v1470_v12, 0.0 }
 0x25f   : > { %v1873_v9 = vadd.f32 %v1872_v18, %v1814_v35  ;;  %v1816_v34 = vmul.f32 %v2861_v15, %v1592_v55  ;;  %v1476_v18 = vadd.f32 %v1475_v32, %v2825_v40  ;;  %v1480_v61 = vadd.f32 %v1479_v31, %v2823_v39 }
 0x260   : > { %v1910_v21 = vadd.f32 %v1909_v57, %v1815_v6  ;;  %v1817_v13 = vmul.f32 %v2861_v15, %v1593_v10  ;;  %v1483_v17 = vpop.f32.mrb[12].mxu1  ;;  %v1478_v15 = vadd.f32 %v1477_v28, %v2823_v39  ;;  %v1822_v14 = vmul.f32 %v2865_v7, %v1598_v20  ;;  %v1719_v2 = vpop.permute.xlu1 %1718 }
 0x261   : > { %v1874_v59 = vadd.f32 %v1873_v9, %v1816_v34  ;;  %v1485_v25 = vpop.f32.mrb[13].mxu1  ;;  %v1602_v0 = vmax.f32 %v1474_v38, 0.0  ;;  %v1484_v40 = vadd.f32 %v1483_v17, %v2829_v42  ;;  %v1823_v32 = vmul.f32 %v2865_v7, %v1599_v29 }
 0x262   : > { %v1911_v24 = vadd.f32 %v1910_v21, %v1817_v13  ;;  %v1487_v27 = vpop.f32.mrb[14].mxu1  ;;  %v1603_v1 = vmax.f32 %v1476_v18, 0.0  ;;  %v1486_v55 = vadd.f32 %v1485_v25, %v2829_v42  ;;  %v1824_v28 = vmul.f32 %v1694_v58, %v1600_v63  ;;  %v1714_v42 = vpop.permute.xlu0 %1713 }
 0x263   : > { %v1875_v57 = vadd.f32 %v1874_v59, %v1818_v19  ;;  %v1489_v26 = vpop.f32.mrb[15].mxu1  ;;  %v1604_v5 = vmax.f32 %v1478_v15, 0.0  ;;  %v1488_v8 = vadd.f32 %v1487_v27, %v2827_v41  ;;  %v1825_v6 = vmul.f32 %v1694_v58, %v1601_v62 }
 0x264   : > { %v1912_v16 = vadd.f32 %v1911_v24, %v1819_v23  ;;  %v1605_v10 = vmax.f32 %v1480_v61, 0.0  ;;  %v1490_v31 = vadd.f32 %v1489_v26, %v2827_v41  ;;  %v1826_v9 = vmul.f32 %v2875_v3, %v1602_v0  ;;  %v1729_v26 = vpop.permute.xlu1 %1728 }
 0x265   : > { %v1876_v36 = vadd.f32 %v1875_v57, %v1820_v37  ;;  %v1606_v7 = vmax.f32 %v1484_v40, 0.0  ;;  %v1827_v21 = vmul.f32 %v2875_v3, %v1603_v1  ;;  %v1607_v17 = vmax.f32 %v1486_v55, 0.0 }
 0x266   : > { %v1913_v35 = vadd.f32 %v1912_v16, %v1821_v30  ;;  %v1828_v20 = vmul.f32 %v1704_v60, %v1604_v5  ;;  %v1608_v41 = vmax.f32 %v1488_v8, 0.0  ;;  %v1829_v23 = vmul.f32 %v1704_v60, %v1605_v10  ;;  %v1724_v16 = vpop.permute.xlu0 %1723 }
 0x267   : > { %v1877_v4 = vadd.f32 %v1876_v36, %v1822_v14  ;;  %v1609_v18 = vmax.f32 %v1490_v31, 0.0  ;;  %v1830_v37 = vmul.f32 %v1709_v22, %v1606_v7  ;;  %v1831_v57 = vmul.f32 %v1709_v22, %v1607_v17 }
 0x268   : > { %v1914_v39 = vadd.f32 %v1913_v35, %v1823_v32  ;;  %v1493_v11 = vpop.f32.mrb[16].mxu1  ;;  %v1832_v30 = vmul.f32 %v1714_v42, %v1608_v41 }
 0x269   : > { %v1878_v34 = vadd.f32 %v1877_v4, %v1824_v28  ;;  %v1494_v33 = vadd.f32 %v1493_v11, %v2833_v44  ;;  %v1495_v12 = vpop.f32.mrb[17].mxu1  ;;  %v1833_v14 = vmul.f32 %v1714_v42, %v1609_v18 }
 0x26a   : > { %v1915_v13 = vadd.f32 %v1914_v39, %v1825_v6  ;;  %v1496_v58 = vadd.f32 %v1495_v12, %v2833_v44  ;;  %v1497_v19 = vpop.f32.mrb[18].mxu1  ;;  %v1734_v12 = vpop.permute.xlu0 %1733 }
 0x26b   : > { %v1879_v38 = vadd.f32 %v1878_v34, %v1826_v9  ;;  %v1498_v59 = vadd.f32 %v1497_v19, %v2831_v43  ;;  %v1499_v25 = vpop.f32.mrb[19].mxu1  ;;  %v1610_v63 = vmax.f32 %v1494_v33, 0.0  ;;  %v1739_v9 = vpop.permute.xlu1 %1738 }
 0x26c   : > { %v1916_v29 = vadd.f32 %v1915_v13, %v1827_v21  ;;  %v1500_v24 = vadd.f32 %v1499_v25, %v2831_v43  ;;  %v1611_v15 = vmax.f32 %v1496_v58, 0.0 }
 0x26d   : > { %v1880_v27 = vadd.f32 %v1879_v38, %v1828_v20  ;;  %v1612_v62 = vmax.f32 %v1498_v59, 0.0  ;;  %v1834_v40 = vmul.f32 %v1719_v2, %v1610_v63 }
 0x26e   : > { %v1917_v3 = vadd.f32 %v1916_v29, %v1829_v23  ;;  %v1613_v0 = vmax.f32 %v1500_v24, 0.0  ;;  %v1835_v35 = vmul.f32 %v1719_v2, %v1611_v15 }
 0x26f   : > { %v1881_v44 = vadd.f32 %v1880_v27, %v1830_v37  ;;  %v1836_v5 = vmul.f32 %v1724_v16, %v1612_v62  ;;  %v1749_v23 = vpop.permute.xlu1 %1748  ;;  %v1744_v27 = vpop.permute.xlu0 %1743 }
 0x270   : > { %v1918_v61 = vadd.f32 %v1917_v3, %v1831_v57  ;;  %v1503_v36 = vpop.f32.mrb[20].mxu1  ;;  %v1837_v39 = vmul.f32 %v1724_v16, %v1613_v0 }
 0x271   : > { %v1882_v60 = vadd.f32 %v1881_v44, %v1832_v30  ;;  %v1504_v32 = vadd.f32 %v1503_v36, %v2837_v46  ;;  %v1505_v43 = vpop.f32.mrb[21].mxu1 }
 0x272   : > { %v1919_v1 = vadd.f32 %v1918_v61, %v1833_v14  ;;  %v1506_v55 = vadd.f32 %v1505_v43, %v2837_v46  ;;  %v1507_v22 = vpop.f32.mrb[22].mxu1 }
 0x273   : > { %v1883_v28 = vadd.f32 %v1882_v60, %v1834_v40  ;;  %v1614_v4 = vmax.f32 %v1504_v32, 0.0  ;;  %v1508_v8 = vadd.f32 %v1507_v22, %v2835_v45  ;;  %v1509_v6 = vpop.f32.mrb[23].mxu1  ;;  %v1754_v60 = vpop.permute.xlu0 %1753 }
 0x274   : > { %v1920_v10 = vadd.f32 %v1919_v1, %v1835_v35  ;;  %v1615_v31 = vmax.f32 %v1506_v55, 0.0  ;;  %v1510_v11 = vadd.f32 %v1509_v6, %v2835_v45 }
 0x275   : > { %v1884_v34 = vadd.f32 %v1883_v28, %v1836_v5  ;;  %v1838_v7 = vmul.f32 %v1729_v26, %v1614_v4  ;;  %v1616_v33 = vmax.f32 %v1508_v8, 0.0 }
 0x276   : > { %v1921_v2 = vadd.f32 %v1920_v10, %v1837_v39  ;;  %v1839_v42 = vmul.f32 %v1729_v26, %v1615_v31  ;;  %v1617_v46 = vmax.f32 %v1510_v11, 0.0 }
 0x277   : > { %v1885_v21 = vadd.f32 %v1884_v34, %v1838_v7  ;;  %v1840_v13 = vmul.f32 %v1734_v12, %v1616_v33  ;;  %v1764_v31 = vpop.permute.xlu0 %1763 }
 0x278   : > { %v1922_v17 = vadd.f32 %v1921_v2, %v1839_v42  ;;  %v1841_v58 = vmul.f32 %v1734_v12, %v1617_v46  ;;  %v1513_v19 = vpop.f32.mrb[24].mxu1 }
 0x279   : > { %v1886_v20 = vadd.f32 %v1885_v21, %v1840_v13  ;;  %v1514_v38 = vadd.f32 %v1513_v19, %v2841_v48  ;;  %v1515_v41 = vpop.f32.mrb[25].mxu1 }
 0x27a   : > { %v1923_v59 = vadd.f32 %v1922_v17, %v1841_v58  ;;  %v1516_v45 = vadd.f32 %v1515_v41, %v2841_v48  ;;  %v1517_v25 = vpop.f32.mrb[26].mxu1  ;;  %v1759_v48 = vpop.permute.xlu1 %1758 }
 0x27b   : > { %v1618_v29 = vmax.f32 %v1514_v38, 0.0  ;;  %v1518_v18 = vadd.f32 %v1517_v25, %v2839_v47  ;;  %v1519_v24 = vpop.f32.mrb[27].mxu1  ;;  %v1207_v38 = vpop.permute.xlu0 %1206 }
 0x27c   : > { %v1619_v37 = vmax.f32 %v1516_v45, 0.0  ;;  %v1520_v63 = vadd.f32 %v1519_v24, %v2839_v47 }
 0x27d   : > { %v1842_v3 = vmul.f32 %v1739_v9, %v1618_v29  ;;  %v1620_v57 = vmax.f32 %v1518_v18, 0.0 }
 0x27e   : > { %v1843_v15 = vmul.f32 %v1739_v9, %v1619_v37  ;;  %v1621_v26 = vmax.f32 %v1520_v63, 0.0  ;;  %v1769_v6 = vpop.permute.xlu1 %1768 }
 0x27f   : > { %v1887_v44 = vadd.f32 %v1886_v20, %v1842_v3  ;;  %v1844_v30 = vmul.f32 %v1744_v27, %v1620_v57 }
 0x280   : > { %v1924_v62 = vadd.f32 %v1923_v59, %v1843_v15  ;;  %v1845_v16 = vmul.f32 %v1744_v27, %v1621_v26  ;;  %v1523_v61 = vpop.f32.mrb[28].mxu1 }
 0x281   : > { %v1888_v14 = vadd.f32 %v1887_v44, %v1844_v30  ;;  %v1524_v0 = vadd.f32 %v1523_v61, %v2845_v50  ;;  %v1525_v36 = vpop.f32.mrb[29].mxu1  ;;  %v1212_v44 = vpop.permute.xlu0 %1211 }
 0x282   : > { %v1925_v40 = vadd.f32 %v1924_v62, %v1845_v16  ;;  %v1526_v32 = vadd.f32 %v1525_v36, %v2845_v50  ;;  %v1527_v43 = vpop.f32.mrb[30].mxu1  ;;  %v1774_v58 = vpop.permute.xlu1 %1773 }
 0x283   : > { %v1622_v47 = vmax.f32 %v1524_v0, 0.0  ;;  %v1528_v1 = vadd.f32 %v1527_v43, %v2843_v49  ;;  %v1529_v35 = vpop.f32.mrb[31].mxu1 }
 0x284   : > { %v1623_v55 = vmax.f32 %v1526_v32, 0.0  ;;  %v1530_v22 = vadd.f32 %v1529_v35, %v2843_v49 }
 0x285   : > { %v1846_v28 = vmul.f32 %v1749_v23, %v1622_v47  ;;  %v1624_v5 = vmax.f32 %v1528_v1, 0.0  ;;  %v1217_v35 = vpop.permute.xlu0 %1216 }
 0x286   : > { %v1847_v4 = vmul.f32 %v1749_v23, %v1623_v55  ;;  %v1625_v8 = vmax.f32 %v1530_v22, 0.0 }
 0x287   : > { %v1889_v10 = vadd.f32 %v1888_v14, %v1846_v28  ;;  %v1848_v39 = vmul.f32 %v1754_v60, %v1624_v5 }
 0x288   : > { %v1926_v11 = vadd.f32 %v1925_v40, %v1847_v4  ;;  %v1849_v9 = vmul.f32 %v1754_v60, %v1625_v8  ;;  %v1533_v34 = vpop.f32.mrb[32].mxu1 }
 0x289   : > { %v1890_v50 = vadd.f32 %v1889_v10, %v1848_v39  ;;  %v1534_v7 = vadd.f32 %v1533_v34, %v2849_v52  ;;  %v1535_v33 = vpop.f32.mrb[33].mxu1 }
 0x28a   : > { %v1927_v12 = vadd.f32 %v1926_v11, %v1849_v9  ;;  %v1536_v2 = vadd.f32 %v1535_v33, %v2849_v52  ;;  %v1537_v42 = vpop.f32.mrb[34].mxu1 }
 0x28b   : > { %v1626_v49 = vmax.f32 %v1534_v7, 0.0  ;;  %v1538_v46 = vadd.f32 %v1537_v42, %v2847_v51  ;;  %v1539_v21 = vpop.f32.mrb[35].mxu1  ;;  %v1222_v7 = vpop.permute.xlu0 %1221 }
 0x28c   : > { %v1627_v13 = vmax.f32 %v1536_v2, 0.0  ;;  %v1540_v17 = vadd.f32 %v1539_v21, %v2847_v51  ;;  %v1779_v51 = vpop.permute.xlu1 %1778 }
 0x28d   : > { %v1850_v19 = vmul.f32 %v1759_v48, %v1626_v49  ;;  %v1628_v20 = vmax.f32 %v1538_v46, 0.0 }
 0x28e   : > { %v1851_v41 = vmul.f32 %v1759_v48, %v1627_v13  ;;  %v1629_v59 = vmax.f32 %v1540_v17, 0.0 }
 0x28f   : > { %v1891_v45 = vadd.f32 %v1890_v50, %v1850_v19  ;;  %v1852_v25 = vmul.f32 %v1764_v31, %v1628_v20 }
 0x290   : > { %v1928_v23 = vadd.f32 %v1927_v12, %v1851_v41  ;;  %v1853_v29 = vmul.f32 %v1764_v31, %v1629_v59  ;;  %v1543_v18 = vpop.f32.mrb[36].mxu1 }
 0x291   : > { %v1892_v52 = vadd.f32 %v1891_v45, %v1852_v25  ;;  %v1544_v24 = vadd.f32 %v1543_v18, %v2853_v54  ;;  %v1545_v27 = vpop.f32.mrb[37].mxu1  ;;  %v1227_v25 = vpop.permute.xlu0 %1226 }
 0x292   : > { %v1929_v37 = vadd.f32 %v1928_v23, %v1853_v29  ;;  %v1546_v63 = vadd.f32 %v1545_v27, %v2853_v54  ;;  %v1547_v3 = vpop.f32.mrb[38].mxu1  ;;  %v1784_v54 = vpop.permute.xlu1 %1783 }
 0x293   : > { %v1630_v57 = vmax.f32 %v1544_v24, 0.0  ;;  %v1548_v15 = vadd.f32 %v1547_v3, %v2851_v53  ;;  %v1549_v26 = vpop.f32.mrb[39].mxu1 }
 0x294   : > { %v1631_v30 = vmax.f32 %v1546_v63, 0.0  ;;  %v1550_v62 = vadd.f32 %v1549_v26, %v2851_v53 }
 0x295   : > { %v1854_v16 = vmul.f32 %v1769_v6, %v1630_v57  ;;  %v1632_v61 = vmax.f32 %v1548_v15, 0.0 }
 0x296   : > { %v1855_v48 = vmul.f32 %v1769_v6, %v1631_v30  ;;  %v1633_v14 = vmax.f32 %v1550_v62, 0.0  ;;  %v1789_v9 = vpop.permute.xlu1 %1788 }
 0x297   : > { %v1893_v0 = vadd.f32 %v1892_v52, %v1854_v16  ;;  %v1856_v36 = vmul.f32 %v1774_v58, %v1632_v61  ;;  %v1799_v16 = vpop.permute.xlu0 %1798 }
 0x298   : > { %v1930_v60 = vadd.f32 %v1929_v37, %v1855_v48  ;;  %v1857_v40 = vmul.f32 %v1774_v58, %v1633_v14  ;;  %v1553_v32 = vpop.f32.mrb[40].mxu1 }
 0x299   : > { %v1894_v43 = vadd.f32 %v1893_v0, %v1856_v36  ;;  %v1554_v47 = vadd.f32 %v1553_v32, %v2855_v56  ;;  %v1555_v1 = vpop.f32.mrb[41].mxu1 }
 0x29a   : > { %v1931_v55 = vadd.f32 %v1930_v60, %v1857_v40  ;;  %v1556_v22 = vadd.f32 %v1555_v1, %v2855_v56  ;;  %v1557_v28 = vpop.f32.mrb[42].mxu1  ;;  %v1794_v45 = vpop.permute.xlu1 %1793 }
 0x29b   : > { %v1634_v53 = vmax.f32 %v1554_v47, 0.0  ;;  %v1558_v5 = vadd.f32 %v1557_v28, %v1207_v38  ;;  %v1559_v4 = vpop.f32.mrb[43].mxu1 }
 0x29c   : > { %v1635_v8 = vmax.f32 %v1556_v22, 0.0  ;;  %v1560_v6 = vadd.f32 %v1559_v4, %v1207_v38 }
 0x29d   : > { %v1858_v10 = vmul.f32 %v1779_v51, %v1634_v53  ;;  %v1636_v39 = vmax.f32 %v1558_v5, 0.0 }
 0x29e   : > { %v1859_v31 = vmul.f32 %v1779_v51, %v1635_v8  ;;  %v1637_v11 = vmax.f32 %v1560_v6, 0.0  ;;  %v1804_v36 = vpop.permute.xlu1 %1803  ;;  %v2275_v8 = vmov 1966171168  }
 0x29f   : > { %v1895_v34 = vadd.f32 %v1894_v43, %v1858_v10  ;;  %v1860_v50 = vmul.f32 %v1784_v54, %v1636_v39  ;;  %v1951_v6 = vunpack.c.l.s4 %v2275_v8  ;;  %v1953_v10 = vlaneseq }
 0x2a0   : > { %v1932_v33 = vadd.f32 %v1931_v55, %v1859_v31  ;;  %v1861_v12 = vmul.f32 %v1784_v54, %v1637_v11  ;;  %v1563_v2 = vpop.f32.mrb[44].mxu1 }
 0x2a1   : > { %v1896_v42 = vadd.f32 %v1895_v34, %v1860_v50  ;;  %v1564_v49 = vadd.f32 %v1563_v2, %v1212_v44  ;;  %v1565_v56 = vpop.f32.mrb[45].mxu1  ;;  %v1952_v50 = vunpack.c.0.s8 %v1951_v6  ;;  %vm1967_vm1 = vcmp.lt.s32.totalorder %v1953_v10, 256 }
 0x2a2   : > { %v1933_v46 = vadd.f32 %v1932_v33, %v1861_v12  ;;  %v1566_v21 = vadd.f32 %v1565_v56, %v1212_v44  ;;  %v1567_v13 = vpop.f32.mrb[46].mxu1 }
 0x2a3   : > { %v1638_v17 = vmax.f32 %v1564_v49, 0.0  ;;  %v1568_v58 = vadd.f32 %v1567_v13, %v1217_v35  ;;  %v1569_v19 = vpop.f32.mrb[47].mxu1 }
 0x2a4   : > { %v1639_v20 = vmax.f32 %v1566_v21, 0.0  ;;  %v1570_v38 = vadd.f32 %v1569_v19, %v1217_v35 }
 0x2a5   : > { %v1862_v41 = vmul.f32 %v1789_v9, %v1638_v17  ;;  %v1640_v59 = vmax.f32 %v1568_v58, 0.0 }
 0x2a6   : > { %v1863_v23 = vmul.f32 %v1789_v9, %v1639_v20  ;;  %v1641_v29 = vmax.f32 %v1570_v38, 0.0  ;;  %v1944_v9 = vstv %s478_s18 }
 0x2a7   : > { %v1897_v18 = vadd.f32 %v1896_v42, %v1862_v41  ;;  %v1864_v52 = vmul.f32 %v1794_v45, %v1640_v59 }
 0x2a8   : > { %v1934_v24 = vadd.f32 %v1933_v46, %v1863_v23  ;;  %v1865_v27 = vmul.f32 %v1794_v45, %v1641_v29  ;;  %v1573_v37 = vpop.f32.mrb[48].mxu1 }
 0x2a9   : > { %v1898_v63 = vadd.f32 %v1897_v18, %v1864_v52  ;;  %v1574_v3 = vadd.f32 %v1573_v37, %v1222_v7  ;;  %v1575_v51 = vpop.f32.mrb[49].mxu1 }
 0x2aa   : > { %v1935_v57 = vadd.f32 %v1934_v24, %v1865_v27  ;;  %v1576_v15 = vadd.f32 %v1575_v51, %v1222_v7  ;;  %v1577_v26 = vpop.f32.mrb[50].mxu1  ;;  %v1954_v7 = vshrl.u32 %v1953_v10, 7 }
 0x2ab   : > { %v1642_v44 = vmax.f32 %v1574_v3, 0.0  ;;  %v1578_v30 = vadd.f32 %v1577_v26, %v1227_v25  ;;  %v1579_v62 = vpop.f32.mrb[51].mxu1 }
 0x2ac   : > { %v1643_v61 = vmax.f32 %v1576_v15, 0.0  ;;  %v1580_v48 = vadd.f32 %v1579_v62, %v1227_v25  ;;  %v1955_v49 = vsub.s32 %v1952_v50, %v1954_v7 }
 0x2ad   : > { %v1866_v14 = vmul.f32 %v1799_v16, %v1642_v44  ;;  %v1644_v0 = vmax.f32 %v1578_v30, 0.0 }
 0x2ae   : > { %v1867_v60 = vmul.f32 %v1799_v16, %v1643_v61  ;;  %v1645_v40 = vmax.f32 %v1580_v48, 0.0 }
 0x2af   : > { %v1899_v32 = vadd.f32 %v1898_v63, %v1866_v14  ;;  %v1868_v54 = vmul.f32 %v1804_v36, %v1644_v0 }
 0x2b0   : > { %v1936_v43 = vadd.f32 %v1935_v57, %v1867_v60  ;;  %v1869_v47 = vmul.f32 %v1804_v36, %v1645_v40 }
 0x2b1   : > { %v1900_v1 = vadd.f32 %v1899_v32, %v1868_v54 }
 0x2b2   : > { %v1937_v35 = vadd.f32 %v1936_v43, %v1869_v47 }
 0x2b3   : > { %v1901_v55 = vrot.slane %v1900_v1, 4 }
 0x2b4   : > { %v1938_v22 = vrot.slane %v1937_v35, 4 }
 0x2b5   : > { %v1902_v28 = vadd.f32 %v1901_v55, %v1900_v1 }
 0x2b6   : > { %v1939_v53 = vadd.f32 %v1938_v22, %v1937_v35 }
 0x2b7   : > { %v1903_v5 = vrot.slane %v1902_v28, 2 }
 0x2b8   : > { %v1940_v4 = vrot.slane %v1939_v53, 2 }
 0x2b9   : > { %v1904_v39 = vadd.f32 %v1903_v5, %v1902_v28 }
 0x2ba   : > { %v1941_v31 = vadd.f32 %v1940_v4, %v1939_v53 }
 0x2bb   : > { %v1905_v11 = vrot.slane %v1904_v39, 1 }
 0x2bc   : > { %v1942_v34 = vrot.slane %v1941_v31, 1 }
 0x2bd   : > { %v1906_v33 = vadd.f32 %v1905_v11, %v1904_v39 }
 0x2be   : > { %v1943_v12 = vadd.f32 %v1942_v34, %v1941_v31 }
 0x2bf   : > { %v1945_v2 = vadd.f32 %v1944_v9, %v1906_v33 }
 0x2c0   : > { %v1946_v42 = vadd.f32 %v1944_v9, %v1943_v12 }
 0x2c2   : > { %v1949_v56 = vcombine.low %v1945_v2, %v1946_v42 }
 0x2c4   : > { %v1956_v46 = vrot.slane %v1949_v56, %v1955_v49 }
 0x2c6   : > { %v1963_v21 = vrot.slane %v1956_v46, %v1955_v49 }
 0x2c8   : > { %1969 = vst.msk [vmem:[%s315_s22] sm:$0x3] %vm1967_vm1, %v1963_v21 }
 0x2c9 PF: > { %s18_s28 = sadd.s32 1, %s2272_s28   ;;  %s2946_s26 = smov %s2268_s27 }
 0x2ca   : > { %p15_p5 = scmp.ge.s32.totalorder %s18_s28, 4   ;;  %s2947_s27 = smov %s2949_s6 }
 0x2cc   :  { %17 = sbr.rel (!%p15_p5) target bundleno = 2 (0x2), region = 78 }

</bundles_post_ra>
